<compile_context>
chip_gen: v7x
topology: tpu7x:2x2x1
jax: 0.10.0
libtpu: 0.0.40
codegen_flags: <defaults>
</compile_context>

<pallas_src>
import functools

import jax
import jax.numpy as jnp
from jax import lax
from jax.experimental import pallas as pl
from jax.experimental.pallas import tpu as pltpu

EPS = 1e-5
LANE = 128


def _round_up(v, m):
    return (v + m - 1) // m * m


def _pad_axis(a, axis, new_size):
    pad = new_size - a.shape[axis]
    if pad == 0:
        return a
    widths = [(0, 0)] * a.ndim
    widths[axis] = (0, pad)
    return jnp.pad(a, widths)


def _make_kernel(H, W, Cinp, Chp, Coutp, stride, add_residual):
    Ho = (H + 2 - 3) // stride + 1
    Wo = (W + 2 - 3) // stride + 1

    def kernel(x_ref, w1_ref, s1_ref, b1_ref, dw_ref,
               s2_ref, b2_ref, w3_ref, s3_ref, b3_ref, out_ref):
        x = x_ref[0]                                        # (H, W, Cinp) f32
        x2 = x.reshape(H * W, Cinp)

        # ---- 1x1 expand conv (MXU, bf16 inputs, f32 accumulate) + BN + ReLU ----
        h = jnp.dot(x2.astype(jnp.bfloat16), w1_ref[...],
                    preferred_element_type=jnp.float32)     # (H*W, Chp)
        h = jnp.maximum(h * s1_ref[...] + b1_ref[...], 0.0)
        h3 = h.reshape(H, W, Chp)

        # ---- 3x3 depthwise conv, padding=1 (in-register shifts, no VMEM scratch) ----
        dwv = dw_ref[...]                                   # (9, Chp)
        taps = [dwv[k][None, None, :] for k in range(9)]    # hoisted broadcasts

        zrow = jnp.zeros((1, W, Chp), jnp.float32)
        zcol = jnp.zeros((H, 1, Chp), jnp.float32)
        # Row-shifted variants (axis 0 = H): whole-tile slab moves, no retiling.
        rows = (jnp.concatenate([zrow, h3[:-1]], axis=0),   # rows[0][i] = h3[i-1]
                h3,                                         # rows[1][i] = h3[i]
                jnp.concatenate([h3[1:], zrow], axis=0))    # rows[2][i] = h3[i+1]

        acc = None
        for di in range(3):
            r = rows[di]
            # Column-shifted variants (axis 1 = W, sublane shifts), zero border.
            cols = (jnp.concatenate([zcol, r[:, :-1]], axis=1),   # r[:, j-1]
                    r,                                            # r[:, j]
                    jnp.concatenate([r[:, 1:], zcol], axis=1))    # r[:, j+1]
            for dj in range(3):
                term = cols[dj] * taps[di * 3 + dj]
                acc = term if acc is None else acc + term

        if stride != 1:
            # One decimation pass instead of nine strided tap reads.
            acc = acc[::stride, ::stride, :]                # (Ho, Wo, Chp)
        h2 = acc.reshape(Ho * Wo, Chp)
        h2 = jnp.maximum(h2 * s2_ref[...] + b2_ref[...], 0.0)

        # ---- 1x1 project conv (MXU, bf16 inputs) + BN (+ residual) ----
        y = jnp.dot(h2.astype(jnp.bfloat16), w3_ref[...],
                    preferred_element_type=jnp.float32)     # (Ho*Wo, Coutp)
        y = y * s3_ref[...] + b3_ref[...]
        if add_residual:
            y = y + x2                                      # Cinp == Coutp here (f32)
        out_ref[0] = y.reshape(Ho, Wo, Coutp)               # lane-dense store

    return kernel, Ho, Wo


def fold_bn(gamma, beta, mean, var, cpad):
    scale = gamma / jnp.sqrt(var + EPS)
    bias = beta - mean * scale
    scale = _pad_axis(scale.reshape(1, -1).astype(jnp.float32), 1, cpad)
    bias = _pad_axis(bias.reshape(1, -1).astype(jnp.float32), 1, cpad)
    return scale, bias


def linear_bottleneck_pallas(x_nchw, params, *, stride, inps, oups):
    """x_nchw: (N, Cin, H, W) float32. Returns (N, Cout, Ho, Wo)."""
    N, Cin, H, W = x_nchw.shape
    Ch = params["w1"].shape[1]
    Cout = params["w3"].shape[1]
    add_residual = (stride == 1 and inps == oups)

    Cinp = _round_up(Cin, LANE)
    Chp = _round_up(Ch, LANE)
    Coutp = _round_up(Cout, LANE)

    # NCHW -> NHWC, zero-pad channel (lane) dims to multiples of 128.
    x = jnp.transpose(x_nchw, (0, 2, 3, 1)).astype(jnp.float32)
    x = _pad_axis(x, 3, Cinp)

    w1 = _pad_axis(_pad_axis(params["w1"].astype(jnp.float32), 0, Cinp), 1, Chp)
    w1 = w1.astype(jnp.bfloat16)                     # MXU-native, halves weight DMA
    dw = _pad_axis(params["dw"].reshape(9, Ch).astype(jnp.float32), 1, Chp)
    w3 = _pad_axis(_pad_axis(params["w3"].astype(jnp.float32), 0, Chp), 1, Coutp)
    w3 = w3.astype(jnp.bfloat16)

    s1, b1 = fold_bn(*params["bn1"], Chp)
    s2, b2 = fold_bn(*params["bn2"], Chp)
    s3, b3 = fold_bn(*params["bn3"], Coutp)

    kernel, Ho, Wo = _make_kernel(H, W, Cinp, Chp, Coutp, stride, add_residual)

    out_nhwc = pl.pallas_call(
        kernel,
        out_shape=jax.ShapeDtypeStruct((N, Ho, Wo, Coutp), jnp.float32),
        grid_spec=pltpu.PrefetchScalarGridSpec(
            num_scalar_prefetch=0,
            grid=(N,),
            in_specs=[
                pl.BlockSpec((1, H, W, Cinp), lambda n: (n, 0, 0, 0)),
                pl.BlockSpec((Cinp, Chp), lambda n: (0, 0)),
                pl.BlockSpec((1, Chp), lambda n: (0, 0)),
                pl.BlockSpec((1, Chp), lambda n: (0, 0)),
                pl.BlockSpec((9, Chp), lambda n: (0, 0)),
                pl.BlockSpec((1, Chp), lambda n: (0, 0)),
                pl.BlockSpec((1, Chp), lambda n: (0, 0)),
                pl.BlockSpec((Chp, Coutp), lambda n: (0, 0)),
                pl.BlockSpec((1, Coutp), lambda n: (0, 0)),
                pl.BlockSpec((1, Coutp), lambda n: (0, 0)),
            ],
            out_specs=pl.BlockSpec((1, Ho, Wo, Coutp), lambda n: (n, 0, 0, 0)),
        ),
        compiler_params=pltpu.CompilerParams(
            dimension_semantics=("parallel",),
            vmem_limit_bytes=32 * 1024 * 1024,
        ),
    )(x, w1, s1, b1, dw, s2, b2, w3, s3, b3)

    out_nhwc = out_nhwc[..., :Cout]                         # drop channel padding
    return jnp.transpose(out_nhwc, (0, 3, 1, 2))            # NHWC -> NCHW


# ---------------- pure-JAX reference (for correctness check) ----------------
def linear_bottleneck_ref(x_nchw, params, *, stride, inps, oups):
    x = jnp.transpose(x_nchw, (0, 2, 3, 1)).astype(jnp.float32)
    dn = ("NHWC", "HWIO", "NHWC")

    def bn(h, g, b, m, v):
        return (h - m) / jnp.sqrt(v + EPS) * g + b

    h = lax.conv_general_dilated(x, params["w1"][None, None], (1, 1), "VALID",
                                 dimension_numbers=dn)
    h = jax.nn.relu(bn(h, *params["bn1"]))
    Ch = params["dw"].shape[-1]
    h = lax.conv_general_dilated(h, params["dw"][:, :, None, :], (stride, stride),
                                 ((1, 1), (1, 1)), dimension_numbers=dn,
                                 feature_group_count=Ch)
    h = jax.nn.relu(bn(h, *params["bn2"]))
    h = lax.conv_general_dilated(h, params["w3"][None, None], (1, 1), "VALID",
                                 dimension_numbers=dn)
    h = bn(h, *params["bn3"])
    if stride == 1 and inps == oups:
        h = h + x
    return jnp.transpose(h, (0, 3, 1, 2))


def init_params(key, inps, oups, t):
    Ch = inps * t
    ks = jax.random.split(key, 12)
    p = {
        # PyTorch conv1 weight is (Ch, Cin, 1, 1); stored here transposed as (Cin, Ch)
        "w1": (jax.random.normal(ks[0], (inps, Ch), jnp.float32) * (1.0 / jnp.sqrt(inps))),
        # PyTorch depthwise weight is (Ch, 1, 3, 3); stored here as (3, 3, Ch)
        "dw": (jax.random.normal(ks[1], (3, 3, Ch), jnp.float32) * (1.0 / 3.0)),
        # PyTorch conv3 weight is (Cout, Ch, 1, 1); stored here transposed as (Ch, Cout)
        "w3": (jax.random.normal(ks[2], (Ch, oups), jnp.float32) * (1.0 / jnp.sqrt(Ch))),
        "bn1": (jax.random.uniform(ks[3], (Ch,), jnp.float32, 0.5, 1.5),
                jax.random.normal(ks[4], (Ch,), jnp.float32) * 0.1,
                jax.random.normal(ks[5], (Ch,), jnp.float32) * 0.1,
                jax.random.uniform(ks[6], (Ch,), jnp.float32, 0.5, 1.5)),
        "bn2": (jax.random.uniform(ks[7], (Ch,), jnp.float32, 0.5, 1.5),
                jax.random.normal(ks[8], (Ch,), jnp.float32) * 0.1,
                jax.random.normal(ks[9], (Ch,), jnp.float32) * 0.1,
                jax.random.uniform(ks[10], (Ch,), jnp.float32, 0.5, 1.5)),
        "bn3": (jnp.ones((oups,), jnp.float32),
                jnp.zeros((oups,), jnp.float32),
                jax.random.normal(ks[11], (oups,), jnp.float32) * 0.1,
                jnp.ones((oups,), jnp.float32)),
    }
    return p


if __name__ == "__main__":
    # Small shapes: batch=2, inps=oups=4, spatial=16x16, expansion t=6 (hidden=24), stride=1.
    N, inps, oups, H, W, t, stride = 2, 4, 4, 16, 16, 6, 1

    key = jax.random.PRNGKey(0)
    kx, kp = jax.random.split(key)
    x = jax.random.normal(kx, (N, inps, H, W), jnp.float32)       # NCHW like PyTorch
    params = init_params(kp, inps, oups, t)

    run = functools.partial(linear_bottleneck_pallas, stride=stride, inps=inps, oups=oups)
    out = jax.block_until_ready(run(x, params))

    ref = jax.block_until_ready(
        linear_bottleneck_ref(x, params, stride=stride, inps=inps, oups=oups))

    assert out.shape == ref.shape == (N, oups, H // stride, W // stride)
    # Tolerance loosened vs. the pure-f32 version because the two 1x1 convs now run
    # with bf16 MXU inputs (f32 accumulation); reference stays f32.
    assert jnp.allclose(out, ref, atol=1e-1, rtol=1e-1), float(jnp.max(jnp.abs(out - ref)))

    print("KERNEL_OK")
</pallas_src>

<mosaic_0001>
module attributes {stable_mosaic.version = 11 : i64} {
  func.func @kernel(%arg0: i32, %arg1: memref<1x16x16x128xf32, #tpu.memory_space<vmem>>, %arg2: memref<128x128xbf16, #tpu.memory_space<vmem>>, %arg3: memref<1x128xf32, #tpu.memory_space<vmem>>, %arg4: memref<1x128xf32, #tpu.memory_space<vmem>>, %arg5: memref<9x128xf32, #tpu.memory_space<vmem>>, %arg6: memref<1x128xf32, #tpu.memory_space<vmem>>, %arg7: memref<1x128xf32, #tpu.memory_space<vmem>>, %arg8: memref<128x128xbf16, #tpu.memory_space<vmem>>, %arg9: memref<1x128xf32, #tpu.memory_space<vmem>>, %arg10: memref<1x128xf32, #tpu.memory_space<vmem>>, %arg11: memref<1x16x16x128xf32, #tpu.memory_space<vmem>>) attributes {dimension_semantics = [#tpu.dimension_semantics<parallel>], iteration_bounds = array<i64: 2>, scalar_prefetch = 0 : i64, scratch_operands = 0 : i64, tpu.core_type = #tpu.core_type<tc>, window_params = [{transform_indices = @transform_0, window_bounds = array<i64: 1, 16, 16, 128>}, {pipeline_mode = #tpu.pipeline_mode<synchronous>, transform_indices = @transform_1, window_bounds = array<i64: 128, 128>}, {pipeline_mode = #tpu.pipeline_mode<synchronous>, transform_indices = @transform_2, window_bounds = array<i64: 1, 128>}, {pipeline_mode = #tpu.pipeline_mode<synchronous>, transform_indices = @transform_3, window_bounds = array<i64: 1, 128>}, {pipeline_mode = #tpu.pipeline_mode<synchronous>, transform_indices = @transform_4, window_bounds = array<i64: 9, 128>}, {pipeline_mode = #tpu.pipeline_mode<synchronous>, transform_indices = @transform_5, window_bounds = array<i64: 1, 128>}, {pipeline_mode = #tpu.pipeline_mode<synchronous>, transform_indices = @transform_6, window_bounds = array<i64: 1, 128>}, {pipeline_mode = #tpu.pipeline_mode<synchronous>, transform_indices = @transform_7, window_bounds = array<i64: 128, 128>}, {pipeline_mode = #tpu.pipeline_mode<synchronous>, transform_indices = @transform_8, window_bounds = array<i64: 1, 128>}, {pipeline_mode = #tpu.pipeline_mode<synchronous>, transform_indices = @transform_9, window_bounds = array<i64: 1, 128>}, {transform_indices = @transform_10, window_bounds = array<i64: 1, 16, 16, 128>}]} {
    %c0 = arith.constant 0 : index
    %c0_0 = arith.constant 0 : index
    %c0_1 = arith.constant 0 : index
    %c0_2 = arith.constant 0 : index
    %0 = vector.load %arg1[%c0, %c0_0, %c0_1, %c0_2] : memref<1x16x16x128xf32, #tpu.memory_space<vmem>>, vector<1x16x16x128xf32>
    %1 = vector.shape_cast %0 : vector<1x16x16x128xf32> to vector<16x16x128xf32>
    %2 = vector.shape_cast %1 : vector<16x16x128xf32> to vector<256x128xf32>
    %3 = arith.truncf %2 : vector<256x128xf32> to vector<256x128xbf16>
    %c0_3 = arith.constant 0 : index
    %c0_4 = arith.constant 0 : index
    %4 = vector.load %arg2[%c0_3, %c0_4] : memref<128x128xbf16, #tpu.memory_space<vmem>>, vector<128x128xbf16>
    %cst = arith.constant dense<0.000000e+00> : vector<256x128xf32>
    %5 = tpu.matmul %3, %4, %cst {dimension_numbers = #tpu.dot_dimension_numbers<[1], [0], [0], [1], [0, 0, 1, 1], [], []>} : vector<256x128xbf16>, vector<128x128xbf16>, vector<256x128xf32> -> vector<256x128xf32>
    %c0_5 = arith.constant 0 : index
    %c0_6 = arith.constant 0 : index
    %6 = vector.load %arg3[%c0_5, %c0_6] : memref<1x128xf32, #tpu.memory_space<vmem>>, vector<1x128xf32>
    %7 = vector.broadcast %6 : vector<1x128xf32> to vector<256x128xf32>
    %8 = arith.mulf %5, %7 : vector<256x128xf32>
    %c0_7 = arith.constant 0 : index
    %c0_8 = arith.constant 0 : index
    %9 = vector.load %arg4[%c0_7, %c0_8] : memref<1x128xf32, #tpu.memory_space<vmem>>, vector<1x128xf32>
    %10 = vector.broadcast %9 : vector<1x128xf32> to vector<256x128xf32>
    %11 = arith.addf %8, %10 : vector<256x128xf32>
    %cst_9 = arith.constant 0.000000e+00 : f32
    %12 = vector.broadcast %cst_9 : f32 to vector<256x128xf32>
    %13 = arith.maximumf %11, %12 : vector<256x128xf32>
    %14 = vector.shape_cast %13 : vector<256x128xf32> to vector<16x16x128xf32>
    %c0_10 = arith.constant 0 : index
    %c0_11 = arith.constant 0 : index
    %15 = vector.load %arg5[%c0_10, %c0_11] : memref<9x128xf32, #tpu.memory_space<vmem>>, vector<9x128xf32>
    %16 = vector.extract_strided_slice %15 {offsets = [0, 0], sizes = [1, 128], strides = [1, 1]} : vector<9x128xf32> to vector<1x128xf32>
    %17 = vector.shape_cast %16 : vector<1x128xf32> to vector<128xf32>
    %18 = vector.shape_cast %17 : vector<128xf32> to vector<1x1x128xf32>
    %19 = vector.extract_strided_slice %15 {offsets = [1, 0], sizes = [1, 128], strides = [1, 1]} : vector<9x128xf32> to vector<1x128xf32>
    %20 = vector.shape_cast %19 : vector<1x128xf32> to vector<128xf32>
    %21 = vector.shape_cast %20 : vector<128xf32> to vector<1x1x128xf32>
    %22 = vector.extract_strided_slice %15 {offsets = [2, 0], sizes = [1, 128], strides = [1, 1]} : vector<9x128xf32> to vector<1x128xf32>
    %23 = vector.shape_cast %22 : vector<1x128xf32> to vector<128xf32>
    %24 = vector.shape_cast %23 : vector<128xf32> to vector<1x1x128xf32>
    %25 = vector.extract_strided_slice %15 {offsets = [3, 0], sizes = [1, 128], strides = [1, 1]} : vector<9x128xf32> to vector<1x128xf32>
    %26 = vector.shape_cast %25 : vector<1x128xf32> to vector<128xf32>
    %27 = vector.shape_cast %26 : vector<128xf32> to vector<1x1x128xf32>
    %28 = vector.extract_strided_slice %15 {offsets = [4, 0], sizes = [1, 128], strides = [1, 1]} : vector<9x128xf32> to vector<1x128xf32>
    %29 = vector.shape_cast %28 : vector<1x128xf32> to vector<128xf32>
    %30 = vector.shape_cast %29 : vector<128xf32> to vector<1x1x128xf32>
    %31 = vector.extract_strided_slice %15 {offsets = [5, 0], sizes = [1, 128], strides = [1, 1]} : vector<9x128xf32> to vector<1x128xf32>
    %32 = vector.shape_cast %31 : vector<1x128xf32> to vector<128xf32>
    %33 = vector.shape_cast %32 : vector<128xf32> to vector<1x1x128xf32>
    %34 = vector.extract_strided_slice %15 {offsets = [6, 0], sizes = [1, 128], strides = [1, 1]} : vector<9x128xf32> to vector<1x128xf32>
    %35 = vector.shape_cast %34 : vector<1x128xf32> to vector<128xf32>
    %36 = vector.shape_cast %35 : vector<128xf32> to vector<1x1x128xf32>
    %37 = vector.extract_strided_slice %15 {offsets = [7, 0], sizes = [1, 128], strides = [1, 1]} : vector<9x128xf32> to vector<1x128xf32>
    %38 = vector.shape_cast %37 : vector<1x128xf32> to vector<128xf32>
    %39 = vector.shape_cast %38 : vector<128xf32> to vector<1x1x128xf32>
    %40 = vector.extract_strided_slice %15 {offsets = [8, 0], sizes = [1, 128], strides = [1, 1]} : vector<9x128xf32> to vector<1x128xf32>
    %41 = vector.shape_cast %40 : vector<1x128xf32> to vector<128xf32>
    %42 = vector.shape_cast %41 : vector<128xf32> to vector<1x1x128xf32>
    %cst_12 = arith.constant 0.000000e+00 : f32
    %43 = vector.broadcast %cst_12 : f32 to vector<1x16x128xf32>
    %cst_13 = arith.constant 0.000000e+00 : f32
    %44 = vector.broadcast %cst_13 : f32 to vector<16x1x128xf32>
    %45 = vector.extract_strided_slice %14 {offsets = [0, 0, 0], sizes = [15, 16, 128], strides = [1, 1, 1]} : vector<16x16x128xf32> to vector<15x16x128xf32>
    %46 = tpu.concatenate %43, %45 in 0 : vector<1x16x128xf32>, vector<15x16x128xf32> -> vector<16x16x128xf32>
    %47 = vector.extract_strided_slice %14 {offsets = [1, 0, 0], sizes = [15, 16, 128], strides = [1, 1, 1]} : vector<16x16x128xf32> to vector<15x16x128xf32>
    %48 = tpu.concatenate %47, %43 in 0 : vector<15x16x128xf32>, vector<1x16x128xf32> -> vector<16x16x128xf32>
    %49 = vector.extract_strided_slice %46 {offsets = [0, 0, 0], sizes = [16, 15, 128], strides = [1, 1, 1]} : vector<16x16x128xf32> to vector<16x15x128xf32>
    %50 = tpu.concatenate %44, %49 in 1 : vector<16x1x128xf32>, vector<16x15x128xf32> -> vector<16x16x128xf32>
    %51 = vector.extract_strided_slice %46 {offsets = [0, 1, 0], sizes = [16, 15, 128], strides = [1, 1, 1]} : vector<16x16x128xf32> to vector<16x15x128xf32>
    %52 = tpu.concatenate %51, %44 in 1 : vector<16x15x128xf32>, vector<16x1x128xf32> -> vector<16x16x128xf32>
    %53 = vector.broadcast %18 : vector<1x1x128xf32> to vector<16x16x128xf32>
    %54 = arith.mulf %50, %53 : vector<16x16x128xf32>
    %55 = vector.broadcast %21 : vector<1x1x128xf32> to vector<16x16x128xf32>
    %56 = arith.mulf %46, %55 : vector<16x16x128xf32>
    %57 = arith.addf %54, %56 : vector<16x16x128xf32>
    %58 = vector.broadcast %24 : vector<1x1x128xf32> to vector<16x16x128xf32>
    %59 = arith.mulf %52, %58 : vector<16x16x128xf32>
    %60 = arith.addf %57, %59 : vector<16x16x128xf32>
    %61 = vector.extract_strided_slice %14 {offsets = [0, 0, 0], sizes = [16, 15, 128], strides = [1, 1, 1]} : vector<16x16x128xf32> to vector<16x15x128xf32>
    %62 = tpu.concatenate %44, %61 in 1 : vector<16x1x128xf32>, vector<16x15x128xf32> -> vector<16x16x128xf32>
    %63 = vector.extract_strided_slice %14 {offsets = [0, 1, 0], sizes = [16, 15, 128], strides = [1, 1, 1]} : vector<16x16x128xf32> to vector<16x15x128xf32>
    %64 = tpu.concatenate %63, %44 in 1 : vector<16x15x128xf32>, vector<16x1x128xf32> -> vector<16x16x128xf32>
    %65 = vector.broadcast %27 : vector<1x1x128xf32> to vector<16x16x128xf32>
    %66 = arith.mulf %62, %65 : vector<16x16x128xf32>
    %67 = arith.addf %60, %66 : vector<16x16x128xf32>
    %68 = vector.broadcast %30 : vector<1x1x128xf32> to vector<16x16x128xf32>
    %69 = arith.mulf %14, %68 : vector<16x16x128xf32>
    %70 = arith.addf %67, %69 : vector<16x16x128xf32>
    %71 = vector.broadcast %33 : vector<1x1x128xf32> to vector<16x16x128xf32>
    %72 = arith.mulf %64, %71 : vector<16x16x128xf32>
    %73 = arith.addf %70, %72 : vector<16x16x128xf32>
    %74 = vector.extract_strided_slice %48 {offsets = [0, 0, 0], sizes = [16, 15, 128], strides = [1, 1, 1]} : vector<16x16x128xf32> to vector<16x15x128xf32>
    %75 = tpu.concatenate %44, %74 in 1 : vector<16x1x128xf32>, vector<16x15x128xf32> -> vector<16x16x128xf32>
    %76 = vector.extract_strided_slice %48 {offsets = [0, 1, 0], sizes = [16, 15, 128], strides = [1, 1, 1]} : vector<16x16x128xf32> to vector<16x15x128xf32>
    %77 = tpu.concatenate %76, %44 in 1 : vector<16x15x128xf32>, vector<16x1x128xf32> -> vector<16x16x128xf32>
    %78 = vector.broadcast %36 : vector<1x1x128xf32> to vector<16x16x128xf32>
    %79 = arith.mulf %75, %78 : vector<16x16x128xf32>
    %80 = arith.addf %73, %79 : vector<16x16x128xf32>
    %81 = vector.broadcast %39 : vector<1x1x128xf32> to vector<16x16x128xf32>
    %82 = arith.mulf %48, %81 : vector<16x16x128xf32>
    %83 = arith.addf %80, %82 : vector<16x16x128xf32>
    %84 = vector.broadcast %42 : vector<1x1x128xf32> to vector<16x16x128xf32>
    %85 = arith.mulf %77, %84 : vector<16x16x128xf32>
    %86 = arith.addf %83, %85 : vector<16x16x128xf32>
    %87 = vector.shape_cast %86 : vector<16x16x128xf32> to vector<256x128xf32>
    %c0_14 = arith.constant 0 : index
    %c0_15 = arith.constant 0 : index
    %88 = vector.load %arg6[%c0_14, %c0_15] : memref<1x128xf32, #tpu.memory_space<vmem>>, vector<1x128xf32>
    %89 = vector.broadcast %88 : vector<1x128xf32> to vector<256x128xf32>
    %90 = arith.mulf %87, %89 : vector<256x128xf32>
    %c0_16 = arith.constant 0 : index
    %c0_17 = arith.constant 0 : index
    %91 = vector.load %arg7[%c0_16, %c0_17] : memref<1x128xf32, #tpu.memory_space<vmem>>, vector<1x128xf32>
    %92 = vector.broadcast %91 : vector<1x128xf32> to vector<256x128xf32>
    %93 = arith.addf %90, %92 : vector<256x128xf32>
    %cst_18 = arith.constant 0.000000e+00 : f32
    %94 = vector.broadcast %cst_18 : f32 to vector<256x128xf32>
    %95 = arith.maximumf %93, %94 : vector<256x128xf32>
    %96 = arith.truncf %95 : vector<256x128xf32> to vector<256x128xbf16>
    %c0_19 = arith.constant 0 : index
    %c0_20 = arith.constant 0 : index
    %97 = vector.load %arg8[%c0_19, %c0_20] : memref<128x128xbf16, #tpu.memory_space<vmem>>, vector<128x128xbf16>
    %cst_21 = arith.constant dense<0.000000e+00> : vector<256x128xf32>
    %98 = tpu.matmul %96, %97, %cst_21 {dimension_numbers = #tpu.dot_dimension_numbers<[1], [0], [0], [1], [0, 0, 1, 1], [], []>} : vector<256x128xbf16>, vector<128x128xbf16>, vector<256x128xf32> -> vector<256x128xf32>
    %c0_22 = arith.constant 0 : index
    %c0_23 = arith.constant 0 : index
    %99 = vector.load %arg9[%c0_22, %c0_23] : memref<1x128xf32, #tpu.memory_space<vmem>>, vector<1x128xf32>
    %100 = vector.broadcast %99 : vector<1x128xf32> to vector<256x128xf32>
    %101 = arith.mulf %98, %100 : vector<256x128xf32>
    %c0_24 = arith.constant 0 : index
    %c0_25 = arith.constant 0 : index
    %102 = vector.load %arg10[%c0_24, %c0_25] : memref<1x128xf32, #tpu.memory_space<vmem>>, vector<1x128xf32>
    %103 = vector.broadcast %102 : vector<1x128xf32> to vector<256x128xf32>
    %104 = arith.addf %101, %103 : vector<256x128xf32>
    %105 = arith.addf %104, %2 : vector<256x128xf32>
    %106 = vector.shape_cast %105 : vector<256x128xf32> to vector<16x16x128xf32>
    %c0_26 = arith.constant 0 : index
    %c0_27 = arith.constant 0 : index
    %c0_28 = arith.constant 0 : index
    %c0_29 = arith.constant 0 : index
    %107 = vector.load %arg11[%c0_26, %c0_27, %c0_28, %c0_29] : memref<1x16x16x128xf32, #tpu.memory_space<vmem>>, vector<1x16x16x128xf32>
    %108 = vector.shape_cast %107 : vector<1x16x16x128xf32> to vector<16x16x128xf32>
    %109 = vector.shape_cast %106 : vector<16x16x128xf32> to vector<1x16x16x128xf32>
    tpu.vector_store %arg11[%c0_26, %c0_27, %c0_28, %c0_29], %109 {strides = array<i32>} : memref<1x16x16x128xf32, #tpu.memory_space<vmem>>, vector<1x16x16x128xf32>,
    return
  }
  func.func @transform_0(%arg0: i32) -> (i32, i32, i32, i32) {
    %c0_i32 = arith.constant 0 : i32
    %c0_i32_0 = arith.constant 0 : i32
    %c0_i32_1 = arith.constant 0 : i32
    %c0_i32_2 = arith.constant 0 : i32
    return %arg0, %c0_i32, %c0_i32_0, %c0_i32_1 : i32, i32, i32, i32
  }
  func.func @transform_1(%arg0: i32) -> (i32, i32) {
    %c0_i32 = arith.constant 0 : i32
    %c0_i32_0 = arith.constant 0 : i32
    %c0_i32_1 = arith.constant 0 : i32
    return %c0_i32, %c0_i32_0 : i32, i32
  }
  func.func @transform_2(%arg0: i32) -> (i32, i32) {
    %c0_i32 = arith.constant 0 : i32
    %c0_i32_0 = arith.constant 0 : i32
    %c0_i32_1 = arith.constant 0 : i32
    return %c0_i32, %c0_i32_0 : i32, i32
  }
  func.func @transform_3(%arg0: i32) -> (i32, i32) {
    %c0_i32 = arith.constant 0 : i32
    %c0_i32_0 = arith.constant 0 : i32
    %c0_i32_1 = arith.constant 0 : i32
    return %c0_i32, %c0_i32_0 : i32, i32
  }
  func.func @transform_4(%arg0: i32) -> (i32, i32) {
    %c0_i32 = arith.constant 0 : i32
    %c0_i32_0 = arith.constant 0 : i32
    %c0_i32_1 = arith.constant 0 : i32
    return %c0_i32, %c0_i32_0 : i32, i32
  }
  func.func @transform_5(%arg0: i32) -> (i32, i32) {
    %c0_i32 = arith.constant 0 : i32
    %c0_i32_0 = arith.constant 0 : i32
    %c0_i32_1 = arith.constant 0 : i32
    return %c0_i32, %c0_i32_0 : i32, i32
  }
  func.func @transform_6(%arg0: i32) -> (i32, i32) {
    %c0_i32 = arith.constant 0 : i32
    %c0_i32_0 = arith.constant 0 : i32
    %c0_i32_1 = arith.constant 0 : i32
    return %c0_i32, %c0_i32_0 : i32, i32
  }
  func.func @transform_7(%arg0: i32) -> (i32, i32) {
    %c0_i32 = arith.constant 0 : i32
    %c0_i32_0 = arith.constant 0 : i32
    %c0_i32_1 = arith.constant 0 : i32
    return %c0_i32, %c0_i32_0 : i32, i32
  }
  func.func @transform_8(%arg0: i32) -> (i32, i32) {
    %c0_i32 = arith.constant 0 : i32
    %c0_i32_0 = arith.constant 0 : i32
    %c0_i32_1 = arith.constant 0 : i32
    return %c0_i32, %c0_i32_0 : i32, i32
  }
  func.func @transform_9(%arg0: i32) -> (i32, i32) {
    %c0_i32 = arith.constant 0 : i32
    %c0_i32_0 = arith.constant 0 : i32
    %c0_i32_1 = arith.constant 0 : i32
    return %c0_i32, %c0_i32_0 : i32, i32
  }
  func.func @transform_10(%arg0: i32) -> (i32, i32, i32, i32) {
    %c0_i32 = arith.constant 0 : i32
    %c0_i32_0 = arith.constant 0 : i32
    %c0_i32_1 = arith.constant 0 : i32
    %c0_i32_2 = arith.constant 0 : i32
    return %arg0, %c0_i32, %c0_i32_0, %c0_i32_1 : i32, i32, i32, i32
  }
}

</mosaic_0001>

<bundles_post_ra>
// kernel: tpu_custom_call.1
= control target key start
LH: loop header
LB: loop body
LE: loop exit
PB: predicated region body
PF: predicated region fallthrough
CT: control target
= control target key end

     0   :  { %s4650_s0 = inlined_call_operand.hbm [shape: f32[2,16,16,128], index: 0, kind: input, shape index: {}]   ;;  %s4651_s1 = inlined_call_operand.hbm [shape: bf16[128,128], index: 1, kind: input, shape index: {}]   ;;  %s4652_s2 = inlined_call_operand.vmem [shape: f32[1,128], index: 2, kind: input, shape index: {}]   ;;  %s4653_s3 = inlined_call_operand.vmem [shape: f32[1,128], index: 3, kind: input, shape index: {}]   ;;  %s4654_s4 = inlined_call_operand.hbm [shape: f32[9,128], index: 4, kind: input, shape index: {}]   ;;  %s4655_s5 = inlined_call_operand.vmem [shape: f32[1,128], index: 5, kind: input, shape index: {}]   ;;  %s4656_s6 = inlined_call_operand.vmem [shape: f32[1,128], index: 6, kind: input, shape index: {}]   ;;  %s4657_s7 = inlined_call_operand.hbm [shape: bf16[128,128], index: 7, kind: input, shape index: {}]   ;;  %s4658_s8 = inlined_call_operand.vmem [shape: f32[1,128], index: 8, kind: input, shape index: {}]   ;;  %s4659_s9 = inlined_call_operand.vmem [shape: f32[1,128], index: 9, kind: input, shape index: {}]   ;;  %s4660_s10 = inlined_call_operand.hbm [shape: f32[2,16,16,128], index: 10, kind: output, shape index: {}]  }
   0x1   :  { %4726 = sst [smem:[#allocation99_spill]] %s4651_s1 }
   0x2   :  { %4727 = sst [smem:[#allocation100_spill]] %s4659_s9 }
   0x3   :  { %4728 = sst [smem:[#allocation101_spill]] %s4660_s10 }
   0x4   :  { %15 = vsyncpa [#allocation3], 0 }
   0x5   :  { %17 = vsyncpa [#allocation3 + $0x1], 0 }
   0x6   :  { %18 = vsyncpa [#allocation6], 0 }
   0x7   :  { %19 = vsyncpa [#allocation9], 0 }
   0x8   :  { %20 = vsyncpa [#allocation4], 0 }
   0x9   :  { %22 = vsyncpa [#allocation4 + $0x1], 0  ;;  %s2815_s13 = smov 0   ;;  %s2817_s14 = smov 0  }
   0xa   :  { %s2819_s15 = smov 0   ;;  %s2821_s16 = smov 0  }
   0xb LB: > { %4729 = sst [smem:[#allocation15_spill]] %s2734_s13  ;;  %s2836_s17 = sadd.s32 4294967295, %s2746_s16   ;;  %s2746_s16 = sphi %s2821_s16, %s5029_s16   ;;  %s2742_s15 = sphi %s2819_s15, %s5028_s15   ;;  %s2738_s14 = sphi %s2817_s14, %s5027_s14   ;;  %s2734_s13 = sphi %s2815_s13, %s5026_s13  }
   0xc   : > { %s2232_s18 = sadd.s32 4294967294, %s2746_s16   ;;  %p48_p0 = scmp.ne.s32.totalorder %s2738_s14, %s2734_s13 }
   0xd   : > { %p4661_p1 = scmp.eq.s32.totalorder %s2836_s17, 0  ;;  %p267_p3 = scmp.eq.s32.totalorder %s2232_s18, 1 }
   0xe   : > { %p2233_p5 = scmp.ge.s32.totalorder %s2746_s16, 1  ;;  %p274_p7 = scmp.lt.s32.totalorder %s2746_s16, 3 }
   0xf   : > { %p2845_p4 = por %p4661_p1, %p48_p0  ;;  %p2850_p6 = por %p267_p3, %p48_p0 }
  0x10   : > { %p2855_p8 = pnand %p2233_p5, %p274_p7  ;;  %s2748_s22 = smov [#allocation5]  }
  0x11   : > { %s4730_s19 = scalar_select %p2845_p4, 1, 0 }
  0x12   : > { %s4731_s20 = scalar_select %p2850_p6, 1, 0 }
  0x13   : > { %s4733_s21 = scalar_select %p2855_p8, 1, 0 }
  0x14   : > { %4732 = sst [smem:[#allocation16_spill]] %s4731_s20  ;;  %s286_s23 = sshll.u32 %s2748_s22, 4  ;;  %s2859_s23 = int_to_ptr.vmem [resolvable:$true] %s286_s23 }
  0x15   : > { %p2437_p9 = pneg %p2855_p8  ;;  %s2749_s25 = smov [#allocation7]  }
  0x16   : > { %s305_s26 = sshll.u32 %s2749_s25, 4  ;;  %s4735_s1 = sld [smem:[#allocation99_spill]]  ;;  %s2870_s26 = int_to_ptr.vmem [resolvable:$true] %s305_s26 }
  0x17   : > { %p2866_p11 = pnand %p2437_p9, %p4661_p1 }
  0x19   : > { %p2880_p13 = pneg %p2866_p11 }
  0x1c   : > { %s2558_s29 = scalar_lea.hbm %s4735_s1, 1024 }
  0x1d   : > { %p2559_p12 = scmp.ne.s32.totalorder %s4735_s1, %s2558_s29  ;;  %p2565_p5 = scmp.lt.u32.totalorder %s2558_s29, %s4735_s1 }
  0x1f   : > { %p2561_p0 = pnand %p2880_p13, %p2559_p12 }
  0x21   : > { %p2562_p3 = pneg %p2561_p0 }
  0x23   : > { %p2567_p7 = pnand %p2565_p5, %p2562_p3 }
  0x25   : > { %2570 = shalt.err (!%p2567_p7)
}
  0x26   : > { %s2571_s25 = scalar_lea.vmem %s2859_s23, 1024  ;;  %p2579_p2 = scmp.lt.s32.totalorder %s2859_s23, %s2859_s23 }
  0x27   : > { %p2572_p9 = scmp.ne.s32.totalorder %s2859_s23, %s2571_s25  ;;  %p2580_p6 = scmp.lt.s32.totalorder %s2571_s25, %s2571_s25 }
  0x29   : > { %p2574_p10 = pnand %p2572_p9, %p2880_p13  ;;  %p2581_p12 = por %p2580_p6, %p2579_p2 }
  0x2b   : > { %p2575_p1 = pneg %p2574_p10 }
  0x2d   : > { %p2582_p0 = pnand %p2581_p12, %p2575_p1 }
  0x2f   : > { %2585 = shalt.err (!%p2582_p0)
}
  0x30   : > { %s4665_s27 = smov 64   ;;  %s4666_s28 = smov 4  }
  0x31   : > { %2440 = dma.hbm_to_vmem [thread:$0]  (!%p2866_p11), %s4735_s1, 1024, %s2859_s23, [#allocation6], %s4665_s27, %s4665_s27, %s4666_s28  }
  0x32   : > { %s2586_s22 = scalar_lea.hbm %s4654_s4, 256 }
  0x33   : > { %p2587_p1 = scmp.ne.s32.totalorder %s4654_s4, %s2586_s22  ;;  %p2593_p10 = scmp.lt.u32.totalorder %s2586_s22, %s4654_s4 }
  0x35   : > { %p2589_p2 = pnand %p2587_p1, %p2880_p13 }
  0x37   : > { %p2590_p6 = pneg %p2589_p2 }
  0x39   : > { %p2595_p3 = pnand %p2593_p10, %p2590_p6 }
  0x3b   : > { %2598 = shalt.err (!%p2595_p3)
}
  0x3c   : > { %s2599_s23 = scalar_lea.vmem %s2870_s26, 256  ;;  %p2607_p12 = scmp.lt.s32.totalorder %s2870_s26, %s2870_s26 }
  0x3d   : > { %p2600_p5 = scmp.ne.s32.totalorder %s2870_s26, %s2599_s23  ;;  %p2608_p0 = scmp.lt.s32.totalorder %s2599_s23, %s2599_s23 }
  0x3f   : > { %p2602_p7 = pnand %p2600_p5, %p2880_p13  ;;  %p2609_p1 = por %p2608_p0, %p2607_p12 }
  0x41   : > { %p2603_p9 = pneg %p2602_p7 }
  0x43   : > { %p2610_p2 = pnand %p2609_p1, %p2603_p9 }
  0x45   : > { %2613 = shalt.err (!%p2610_p2)
}
  0x46   : > { %s2752_s20 = smov 128   ;;  %s2753_s10 = smov 8  }
  0x47   : > { %2443 = dma.hbm_to_vmem [thread:$0]  (!%p2866_p11), %s4654_s4, 256, %s2870_s26, [#allocation6], %s2752_s20, %s2752_s20, %s2753_s10  }
  0x48   : > { %s2754_s30 = smov [#allocation8]   ;;  %s2931_s18 = sadd.s32 1, %s2746_s16  }
  0x49   : > { %s324_s11 = sshll.u32 %s2754_s30, 4  ;;  %s2614_s23 = scalar_lea.hbm %s4657_s7, 1024  ;;  %s325_s11 = int_to_ptr.vmem [resolvable:$true] %s324_s11 }
  0x4a   : > { %p2615_p6 = scmp.ne.s32.totalorder %s4657_s7, %s2614_s23  ;;  %p2621_p5 = scmp.lt.u32.totalorder %s2614_s23, %s4657_s7 }
  0x4c   : > { %p2617_p10 = pnand %p2615_p6, %p2880_p13 }
  0x4e   : > { %p2618_p3 = pneg %p2617_p10 }
  0x50   : > { %p2623_p7 = pnand %p2621_p5, %p2618_p3 }
  0x52   : > { %2626 = shalt.err (!%p2623_p7)
}
  0x53   : > { %s2627_s26 = scalar_lea.vmem %s325_s11, 1024  ;;  %p2635_p1 = scmp.lt.s32.totalorder %s325_s11, %s325_s11 }
  0x54   : > { %p2628_p9 = scmp.ne.s32.totalorder %s325_s11, %s2627_s26  ;;  %p2636_p2 = scmp.lt.s32.totalorder %s2627_s26, %s2627_s26 }
  0x56   : > { %p2630_p12 = pnand %p2628_p9, %p2880_p13  ;;  %p2637_p4 = por %p2636_p2, %p2635_p1 }
  0x58   : > { %p2631_p0 = pneg %p2630_p12 }
  0x5a   : > { %p2638_p8 = pnand %p2637_p4, %p2631_p0 }
  0x5c   : > { %2641 = shalt.err (!%p2638_p8)
}
  0x5d   : > { %s4737_s27 = smov 4   ;;  %s4738_s28 = smov 64  }
  0x5e   : > { %2446 = dma.hbm_to_vmem [thread:$0]  (!%p2866_p11), %s4657_s7, 1024, %s325_s11, [#allocation9], %s4738_s28, %s4738_s28, %s4737_s27  }
  0x5f   : > { %s32_s12 = ssub.s32 %s2746_s16, %s2931_s18  ;;  %s35_s24 = sadd.s32 1, %s2742_s15 }
  0x60   : > { %p33_p4 = scmp.eq.s32.totalorder %s32_s12, 0  ;;  %p42_p8 = scmp.ne.s32.totalorder %s2742_s15, %s2738_s14 }
  0x61   : > { %p43_p13 = scmp.eq.s32.totalorder %s2746_s16, 0  ;;  %p2458_p6 = scmp.lt.s32.totalorder %s2746_s16, 2 }
  0x62   : > { %s2962_s13 = scalar_select %p33_p4, %s2742_s15, %s35_s24  }
  0x63   : > { %p44_p10 = por %p43_p13, %p42_p8  ;;  %p4739_p3 = scmp.eq.s32.totalorder %s2836_s17, 1 }
  0x64   : > { %s344_s30 = sand.u32 1, %s2742_s15   ;;  %s2275_s22 = sshll.u32 %s2746_s16, 12 }
  0x65   : > { %p2966_p5 = por %p4739_p3, %p42_p8  ;;  %s2238_s25 = sshll.u32 %s344_s30, 8 }
  0x66   : > { %s2975_s11 = scalar_lea.hbm %s4650_s0, %s2275_s22  ;;  %s348_s27 = scalar_lea.vmem [#allocation2], %s2238_s25 }
  0x67   : > { %s355_s28 = sshll.u32 %s348_s27, 4  ;;  %p2977_p11 = pnand %p2458_p6, %p44_p10  ;;  %s2981_s28 = int_to_ptr.vmem [resolvable:$true] %s355_s28 }
  0x68   : > { %s2983_s9 = scalar_lea.sflag [#allocation3], %s344_s30  ;;  %s2642_s12 = scalar_lea.hbm %s2975_s11, 4096 }
  0x69   : > { %p2643_p7 = scmp.ne.s32.totalorder %s2975_s11, %s2642_s12  ;;  %p2644_p9 = pneg %p2977_p11 }
  0x6a   : > { %s2647_s25 = scalar_lea.hbm %s4650_s0, 8192  ;;  %p2648_p1 = scmp.lt.u32.totalorder %s2975_s11, %s4650_s0 }
  0x6b   : > { %p2645_p12 = pnand %p2644_p9, %p2643_p7  ;;  %p2649_p2 = scmp.lt.u32.totalorder %s2647_s25, %s2642_s12 }
  0x6c   : > { %p2651_p8 = scmp.lt.u32.totalorder %s2642_s12, %s2975_s11 }
  0x6d   : > { %p2646_p0 = pneg %p2645_p12  ;;  %p2650_p4 = por %p2649_p2, %p2648_p1 }
  0x6f   : > { %p2652_p13 = por %p2651_p8, %p2650_p4 }
  0x71   : > { %p2653_p6 = pnand %p2652_p13, %p2646_p0 }
  0x73   : > { %2656 = shalt.err (!%p2653_p6)
}
  0x74   : > { %s2657_s30 = scalar_lea.vmem %s2981_s28, 4096  ;;  %s2755_s27 = smov [#allocation2]  }
  0x75   : > { %p2658_p10 = scmp.ne.s32.totalorder %s2981_s28, %s2657_s30  ;;  %s2662_s24 = sshll.u32 %s2755_s27, 4  ;;  %s2663_s24 = int_to_ptr.vmem [resolvable:$false] %s2662_s24 }
  0x76   : > { %s2664_s22 = scalar_lea.vmem %s2663_s24, 8192  ;;  %p2665_p12 = scmp.lt.s32.totalorder %s2981_s28, %s2663_s24 }
  0x77   : > { %p2660_p3 = pnand %p2658_p10, %p2644_p9  ;;  %p2666_p1 = scmp.lt.s32.totalorder %s2664_s22, %s2657_s30 }
  0x79   : > { %p2661_p7 = pneg %p2660_p3  ;;  %p2667_p2 = por %p2666_p1, %p2665_p12 }
  0x7b   : > { %p2668_p4 = pnand %p2667_p2, %p2661_p7 }
  0x7d   : > { %2671 = shalt.err (!%p2668_p4)
}
  0x7e   : > { %2450 = dma.hbm_to_vmem [thread:$0]  (!%p2977_p11), %s2975_s11, 4096, %s2981_s28, %s2983_s9, %s2752_s20, %s2752_s20, %s2753_s10  }
  0x7f   : > { %p4742_p9 = scmp.ne.s32.totalorder %s4733_s21, 0 }
  0x81   : > { %367 = sbr.rel (%p4742_p9) target bundleno = 866 (0x362), region = 60 }
  0x88   : > { %s3017_s12 = sand.u32 1, %s2738_s14   ;;  %p4743_p0 = scmp.ne.s32.totalorder %s4730_s19, 0 }
  0x89   : > { %s2242_s25 = sshll.u32 %s3017_s12, 8  ;;  %s370_s23 = scalar_lea.sflag [#allocation3], %s3017_s12 }
  0x8a   : > { %s3023_s1 = scalar_lea.vmem [#allocation2], %s2242_s25 }
  0x8b   : > { %2717 = dma.done.wait (%p4743_p0), %s370_s23, 4096  }
  0x8c   : > { %2719 = vsyncadd (%p4743_p0), %s370_s23, 4294963200  ;;  %p4744_p11 = scmp.eq.s32.totalorder %s2836_s17, 0 }
  0x8e   : > { %2721 = dma.done.wait (%p4744_p11), [#allocation6], 1280   ;;  %p4745_p8 = pmov %p4744_p11 }
  0x90   : > { %2723 = vsyncadd (%p4745_p8), [#allocation6], 4294966016  ;;  %p4746_p13 = pmov %p4745_p8 }
  0x91   : > { %p4747_p6 = pmov %p4745_p8 }
  0x92   : > { %2725 = dma.done.wait (%p4746_p13), [#allocation9], 1024  }
  0x93   : > { %2727 = vsyncadd (%p4747_p6), [#allocation9], 4294966272  ;;  %v2505_v0 = vld [vmem:[#allocation5] sm:$0xff]   ;;  %v2506_v1 = vld [vmem:[#allocation5 + $0x8] sm:$0xff]   ;;  %vm839_vm0 = vcmask 1040384   ;;  %vm935_vm1 = vcmask 1046528  }
  0x94   : > { %2325 = vmatprep.subr.bf16.mxu0 %v2505_v0  ;;  %v2507_v2 = vld [vmem:[#allocation5 + $0x10] sm:$0xff]   ;;  %v2508_v3 = vld [vmem:[#allocation5 + $0x18] sm:$0xff]   ;;  %v423_v4 = vld [vmem:[%s3023_s1] sm:$0xff]  ;;  %s5019_s26 = sld [smem:[#allocation100_spill]]  ;;  %s4479_s30 = scalar_lea.vmem [#allocation10], %s2242_s25 }
  0x95   : > { %2326 = vmatpush3.bf16.msra.mxu0 %v2505_v0  ;;  %v424_v5 = vld [vmem:[%s3023_s1 + $0x8] sm:$0xff]  ;;  %v2509_v7 = vld [vmem:[#allocation5 + $0x20] sm:$0xff]   ;;  %v2511_v9 = vld [vmem:[#allocation5 + $0x30] sm:$0xff]   ;;  %v1031_v0 = vlaneseq  ;;  %s2276_s25 = sshll.u32 %s2836_s17, 12  ;;  %s2130_s27 = sshll.u32 %s4479_s30, 4  ;;  %s4602_s27 = int_to_ptr.vmem [resolvable:$true] %s2130_s27 }
  0x96   : > { %2327 = vmatprep.subr.bf16.mxu0 %v2506_v1  ;;  %v455_v6 = vpack.c.bf16 %v424_v5, %v423_v4  ;;  %v2510_v8 = vld [vmem:[#allocation5 + $0x28] sm:$0xff]   ;;  %v2512_v10 = vld [vmem:[#allocation5 + $0x38] sm:$0xff]   ;;  %v425_v11 = vld [vmem:[%s3023_s1 + $0x10] sm:$0xff]  ;;  %v2756_v5 = vmov 0.0   ;;  %s5020_s23 = sld [smem:[#allocation101_spill]]  ;;  %s2117_s19 = scalar_lea.sflag [#allocation4], %s3017_s12 }
  0x97   : > { %v426_v12 = vld [vmem:[%s3023_s1 + $0x18] sm:$0xff]  ;;  %v427_v13 = vld [vmem:[%s3023_s1 + $0x20] sm:$0xff]  ;;  %v428_v14 = vld [vmem:[%s3023_s1 + $0x28] sm:$0xff]  ;;  %s2672_s21 = scalar_lea.vmem %s4602_s27, 4096  ;;  %s2757_s20 = smov [#allocation10]  }
  0x98   : > { %2341 = vmatprep.mubr.bf16.mxu0 %v455_v6  ;;  %v456_v15 = vpack.c.bf16 %v426_v12, %v425_v11  ;;  %v457_v16 = vpack.c.bf16 %v428_v14, %v427_v13  ;;  %v429_v17 = vld [vmem:[%s3023_s1 + $0x30] sm:$0xff]  ;;  %v430_v18 = vld [vmem:[%s3023_s1 + $0x38] sm:$0xff]  ;;  %v431_v19 = vld [vmem:[%s3023_s1 + $0x40] sm:$0xff]  ;;  %v3069_v6 = vrot.slane %v2756_v5, 7  ;;  %v3079_v11 = vrot.slane %v2756_v5, 1  ;;  %p2673_p10 = scmp.ne.s32.totalorder %s4602_s27, %s2672_s21  ;;  %s2676_s10 = sshll.u32 %s2757_s20, 4  ;;  %s2677_s10 = int_to_ptr.vmem [resolvable:$false] %s2676_s10 }
  0x99   : > { %2328 = vmatpush3.bf16.msra.mxu0 %v2506_v1  ;;  %v432_v20 = vld [vmem:[%s3023_s1 + $0x48] sm:$0xff]  ;;  %v458_v21 = vpack.c.bf16 %v430_v18, %v429_v17  ;;  %v433_v23 = vld [vmem:[%s3023_s1 + $0x50] sm:$0xff]  ;;  %v434_v24 = vld [vmem:[%s3023_s1 + $0x58] sm:$0xff]  ;;  %v1032_v1 = vshrl.u32 %v1031_v0, 7  ;;  %s2678_s11 = scalar_lea.vmem %s2677_s10, 8192  ;;  %p2679_p12 = scmp.lt.s32.totalorder %s4602_s27, %s2677_s10 }
  0x9a   : > { %2329 = vmatprep.subr.bf16.mxu0 %v2507_v2  ;;  %v459_v22 = vpack.c.bf16 %v432_v20, %v431_v19  ;;  %v435_v25 = vld [vmem:[%s3023_s1 + $0x60] sm:$0xff]  ;;  %v436_v26 = vld [vmem:[%s3023_s1 + $0x68] sm:$0xff]  ;;  %v460_v27 = vpack.c.bf16 %v434_v24, %v433_v23  ;;  %v437_v29 = vld [vmem:[%s3023_s1 + $0x70] sm:$0xff]  ;;  %4748 = vst [vmem:[#allocation17_spill] sm:$0xff] %v3069_v6  ;;  %v3095_v17 = vsel %vm935_vm1, %v3079_v11, 0.0  ;;  %p2674_p3 = pnand %p2673_p10, %p2966_p5  ;;  %p2680_p1 = scmp.lt.s32.totalorder %s2678_s11, %s2672_s21 }
  0x9b   : > { %v461_v28 = vpack.c.bf16 %v436_v26, %v435_v25  ;;  %v438_v30 = vld [vmem:[%s3023_s1 + $0x78] sm:$0xff]  ;;  %v439_v31 = vld [vmem:[%s3023_s1 + $0x80] sm:$0xff]  ;;  %v440_v32 = vld [vmem:[%s3023_s1 + $0x88] sm:$0xff]  ;;  %4750 = vst [vmem:[#allocation19_spill] sm:$0xff] %v3079_v11  ;;  %v1286_v20 = vsub.s32 4, %v1032_v1  ;;  %v1354_v26 = vsub.s32 5, %v1032_v1 }
  0x9c   : > { %v462_v33 = vpack.c.bf16 %v438_v30, %v437_v29  ;;  %v463_v34 = vpack.c.bf16 %v440_v32, %v439_v31  ;;  %v441_v35 = vld [vmem:[%s3023_s1 + $0x90] sm:$0xff]  ;;  %v442_v36 = vld [vmem:[%s3023_s1 + $0x98] sm:$0xff]  ;;  %v443_v37 = vld [vmem:[%s3023_s1 + $0xa0] sm:$0xff]  ;;  %4751 = vst [vmem:[#allocation20_spill] sm:$0xff] %v3095_v17  ;;  %v1422_v31 = vsub.s32 6, %v1032_v1  ;;  %s4600_s17 = scalar_lea.hbm %s5020_s23, %s2276_s25  ;;  %p2675_p7 = pneg %p2674_p3 }
  0x9d   : > { %2330 = vmatpush3.bf16.msra.mxu0 %v2507_v2  ;;  %v444_v38 = vld [vmem:[%s3023_s1 + $0xa8] sm:$0xff]  ;;  %v464_v39 = vpack.c.bf16 %v442_v36, %v441_v35  ;;  %v445_v41 = vld [vmem:[%s3023_s1 + $0xb0] sm:$0xff]  ;;  %v446_v42 = vld [vmem:[%s3023_s1 + $0xb8] sm:$0xff]  ;;  %v1069_v2 = vsub.s32 1, %v1032_v1  ;;  %v1490_v35 = vsub.s32 7, %v1032_v1  ;;  %p2681_p2 = por %p2680_p1, %p2679_p12 }
  0x9e   : > { %2331 = vmatprep.subr.bf16.mxu0 %v2508_v3  ;;  %v465_v40 = vpack.c.bf16 %v444_v38, %v443_v37  ;;  %v447_v43 = vld [vmem:[%s3023_s1 + $0xc0] sm:$0xff]  ;;  %v448_v44 = vld [vmem:[%s3023_s1 + $0xc8] sm:$0xff]  ;;  %v466_v45 = vpack.c.bf16 %v446_v42, %v445_v41  ;;  %v449_v47 = vld [vmem:[%s3023_s1 + $0xd0] sm:$0xff] }
  0x9f   : > { %v467_v46 = vpack.c.bf16 %v448_v44, %v447_v43  ;;  %v450_v48 = vld [vmem:[%s3023_s1 + $0xd8] sm:$0xff]  ;;  %v451_v49 = vld [vmem:[%s3023_s1 + $0xe0] sm:$0xff]  ;;  %v452_v50 = vld [vmem:[%s3023_s1 + $0xe8] sm:$0xff]  ;;  %p2682_p4 = pnand %p2681_p2, %p2675_p7 }
  0xa0   : > { %v468_v51 = vpack.c.bf16 %v450_v48, %v449_v47  ;;  %v469_v52 = vpack.c.bf16 %v452_v50, %v451_v49  ;;  %v453_v53 = vld [vmem:[%s3023_s1 + $0xf0] sm:$0xff]  ;;  %v454_v54 = vld [vmem:[%s3023_s1 + $0xf8] sm:$0xff]  ;;  %v2515_v58 = vld [vmem:[#allocation8 + $0x10] sm:$0xff]  }
  0xa1   : > { %2332 = vmatpush3.bf16.msra.mxu0 %v2508_v3  ;;  %v470_v55 = vpack.c.bf16 %v454_v54, %v453_v53  ;;  %v2513_v56 = vld [vmem:[#allocation8] sm:$0xff]   ;;  %v2514_v57 = vld [vmem:[#allocation8 + $0x8] sm:$0xff]   ;;  %v2516_v59 = vld [vmem:[#allocation8 + $0x18] sm:$0xff]   ;;  %v1033_v3 = vsub.s32 0, %v1032_v1 }
  0xa2   : > { %2333 = vmatprep.subr.bf16.mxu0 %v2509_v7  ;;  %2373 = vmatprep.subr.bf16.mxu1 %v2513_v56  ;;  %v2517_v60 = vld [vmem:[#allocation8 + $0x20] sm:$0xff]   ;;  %v2518_v61 = vld [vmem:[#allocation8 + $0x28] sm:$0xff]   ;;  %v2519_v62 = vld [vmem:[#allocation8 + $0x30] sm:$0xff]  }
  0xa3   : > { %2374 = vmatpush3.bf16.msra.mxu1 %v2513_v56  ;;  %v2520_v63 = vld [vmem:[#allocation8 + $0x38] sm:$0xff]   ;;  %v806_v4 = vld [vmem:[#allocation7] sm:$0xff] }
  0xa4   : > { %2375 = vmatprep.subr.bf16.mxu1 %v2514_v57  ;;  %v3100_v19 = vld [vmem:[%s4653_s3] ss:$0 sm:$0xff]  ;;  %v3110_v36 = vrot.slane %v806_v4, %v1286_v20  ;;  %v3119_v43 = vrot.slane %v806_v4, %v1354_v26  ;;  %v3124_v47 = vrot.slane %v806_v4, %v1422_v31 }
  0xa5   : > { %2334 = vmatpush3.bf16.msra.mxu0 %v2509_v7  ;;  %v3071_v7 = vrot.slane %v806_v4, %v1069_v2 }
  0xa6   : > { %2335 = vmatprep.subr.bf16.mxu0 %v2510_v8 }
  0xa7   : > { %2376 = vmatpush3.bf16.msra.mxu1 %v2514_v57  ;;  %v1071_v13 = vmul.f32 0.0, %v3071_v7 }
  0xa8   : > { %2377 = vmatprep.subr.bf16.mxu1 %v2515_v58 }
  0xa9   : > { %2336 = vmatpush3.bf16.msra.mxu0 %v2510_v8  ;;  %v3073_v8 = vrot.slane %v806_v4, %v1033_v3 }
  0xaa   : > { %2337 = vmatprep.subr.bf16.mxu0 %v2511_v9 }
  0xab   : > { %2378 = vmatpush3.bf16.msra.mxu1 %v2515_v58 }
  0xac   : > { %2379 = vmatprep.subr.bf16.mxu1 %v2516_v59 }
  0xad   : > { %2338 = vmatpush3.bf16.msra.mxu0 %v2511_v9  ;;  %v1136_v9 = vsub.s32 2, %v1032_v1 }
  0xae   : > { %2339 = vmatprep.subr.bf16.mxu0 %v2512_v10 }
  0xaf   : > { %2380 = vmatpush3.bf16.msra.mxu1 %v2516_v59  ;;  %v3084_v14 = vrot.slane %v806_v4, %v1136_v9 }
  0xb0   : > { %2381 = vmatprep.subr.bf16.mxu1 %v2517_v60 }
  0xb1   : > { %2340 = vmatpush3.bf16.msra.mxu0 %v2512_v10  ;;  %v3077_v10 = vsel %vm839_vm0, 0.0, %v3069_v6  ;;  %v1138_v25 = vmul.f32 %v3084_v14, %v3079_v11  ;;  %v1139_v30 = vmul.f32 %v3084_v14, %v3095_v17 }
  0xb2   : > { %4749 = vst [vmem:[#allocation18_spill] sm:$0xff] %v3077_v10  ;;  %v1035_v12 = vmul.f32 %v3073_v8, %v3077_v10 }
  0xb3   : > { %2382 = vmatpush3.bf16.msra.mxu1 %v2517_v60 }
  0xb4   : > { %2342 = vmatmul.mubr.bf16.vlgmr.msra.gmra.mrb[0].mxu0 %v456_v15  ;;  %2383 = vmatprep.subr.bf16.mxu1 %v2518_v61  ;;  %v3089_v15 = vld [vmem:[%s4652_s2] ss:$0 sm:$0xff]  ;;  %v1102_v24 = vadd.f32 %v1071_v13, %v1035_v12 }
  0xb5   : > { %2345 = vmatprep.mubr.bf16.mxu0 %v457_v16  ;;  %v1036_v16 = vmul.f32 %v3073_v8, %v3069_v6 }
  0xb6   : > { %v1170_v41 = vadd.f32 %v1138_v25, %v1102_v24 }
  0xb7   : > { %2384 = vmatpush3.bf16.msra.mxu1 %v2518_v61  ;;  %v1103_v29 = vadd.f32 %v1071_v13, %v1036_v16 }
  0xb8   : > { %2385 = vmatprep.subr.bf16.mxu1 %v2519_v62 }
  0xbb   : > { %2386 = vmatpush3.bf16.msra.mxu1 %v2519_v62 }
  0xbc   : > { %2346 = vmatmul.mubr.bf16.gmra.mrb[4].mxu0 %v458_v21  ;;  %2387 = vmatprep.subr.bf16.mxu1 %v2520_v63  ;;  %v1218_v21 = vsub.s32 3, %v1032_v1 }
  0xbd   : > { %2349 = vmatprep.mubr.bf16.mxu0 %v459_v22 }
  0xbe   : > { %v3113_v38 = vrot.slane %v806_v4, %v1218_v21 }
  0xbf   : > { %2388 = vmatpush3.bf16.msra.mxu1 %v2520_v63 }
  0xc4   : > { %2350 = vmatmul.mubr.bf16.gmra.mrb[8].mxu0 %v460_v27 }
  0xc5   : > { %2353 = vmatprep.mubr.bf16.mxu0 %v461_v28 }
  0xcc   : > { %2354 = vmatmul.mubr.bf16.gmra.mrb[12].mxu0 %v462_v33 }
  0xcd   : > { %2357 = vmatprep.mubr.bf16.mxu0 %v463_v34 }
  0xd4   : > { %2358 = vmatmul.mubr.bf16.gmra.mrb[16].mxu0 %v464_v39 }
  0xd5   : > { %2361 = vmatprep.mubr.bf16.mxu0 %v465_v40 }
  0xdc   : > { %2362 = vmatmul.mubr.bf16.gmra.mrb[20].mxu0 %v466_v45 }
  0xdd   : > { %2365 = vmatprep.mubr.bf16.mxu0 %v467_v46  ;;  %v1171_v46 = vadd.f32 %v1139_v30, %v1103_v29 }
  0xe4   : > { %2366 = vmatmul.mubr.bf16.gmra.mrb[24].mxu0 %v468_v51  ;;  %v3133_v51 = vrot.slane %v806_v4, %v1490_v35 }
  0xe5   : > { %2369 = vmatprep.mubr.bf16.mxu0 %v469_v52 }
  0xec   : > { %2370 = vmatmul.mubr.bf16.gmra.mrb[28].mxu0 %v470_v55 }
 0x187   : > { %v2343_v18 = vpop.f32.mrb[0].mxu0 }
 0x188   : > { %v705_v22 = vmul.f32 %v2343_v18, %v3089_v15  ;;  %v569_v23 = vpop.f32.mrb[1].mxu0 }
 0x189   : > { %v703_v27 = vmul.f32 %v3089_v15, %v569_v23  ;;  %v2344_v28 = vpop.f32.mrb[2].mxu0 }
 0x18a   : > { %v744_v32 = vadd.f32 %v3100_v19, %v705_v22  ;;  %v706_v33 = vmul.f32 %v2344_v28, %v3089_v15  ;;  %v572_v34 = vpop.f32.mrb[3].mxu0 }
 0x18b   : > { %v742_v37 = vadd.f32 %v3100_v19, %v703_v27  ;;  %v704_v39 = vmul.f32 %v3089_v15, %v572_v34 }
 0x18c   : > { %v3116_v40 = vmax.f32 %v744_v32, 0.0  ;;  %v745_v42 = vadd.f32 %v3100_v19, %v706_v33 }
 0x18d   : > { %v3121_v44 = vmax.f32 %v742_v37, 0.0  ;;  %v743_v45 = vadd.f32 %v3100_v19, %v704_v39 }
 0x18e   : > { %v845_v48 = vrot.slane %v3116_v40, 7  ;;  %v3129_v49 = vmul.f32 %v3071_v7, %v3116_v40  ;;  %v3131_v50 = vmax.f32 %v745_v42, 0.0  ;;  %v3137_v52 = vmul.f32 %v3110_v36, %v3116_v40 }
 0x18f   : > { %v842_v53 = vrot.slane %v3121_v44, 7  ;;  %v1072_v55 = vmul.f32 %v3071_v7, %v3121_v44  ;;  %v2347_v56 = vpop.f32.mrb[4].mxu0  ;;  %v1288_v57 = vmul.f32 %v3110_v36, %v3121_v44  ;;  %v3150_v60 = vmax.f32 %v743_v45, 0.0 }
 0x190   : > { %v846_v58 = vrot.slane %v3131_v50, 7  ;;  %v3148_v59 = vmul.f32 %v3071_v7, %v3131_v50  ;;  %v585_v61 = vpop.f32.mrb[5].mxu0  ;;  %v3155_v63 = vmul.f32 %v3110_v36, %v3131_v50  ;;  %v709_v0 = vmul.f32 %v2347_v56, %v3089_v15 }
 0x191   : > { %v920_v62 = vsel %vm839_vm0, 0.0, %v842_v53  ;;  %v707_v1 = vmul.f32 %v3089_v15, %v585_v61  ;;  %v2348_v2 = vpop.f32.mrb[6].mxu0  ;;  %v843_v5 = vrot.slane %v3150_v60, 7  ;;  %v4669_v9 = vrot.slane %v3150_v60, 1 }
 0x192   : > { %v1037_v3 = vmul.f32 %v3073_v8, %v920_v62  ;;  %v1220_v4 = vmul.f32 %v3113_v38, %v920_v62  ;;  %v588_v12 = vpop.f32.mrb[7].mxu0  ;;  %v1073_v13 = vmul.f32 %v3071_v7, %v3150_v60  ;;  %v748_v16 = vadd.f32 %v3100_v19, %v709_v0 }
 0x193   : > { %v746_v18 = vadd.f32 %v3100_v19, %v707_v1  ;;  %v3168_v20 = vsel %vm839_vm0, 0.0, %v845_v48  ;;  %v844_v22 = vsel %vm839_vm0, %v842_v53, %v843_v5  ;;  %v1016_v23 = vsel %vm935_vm1, %v4669_v9, 0.0 }
 0x194   : > { %v1252_v21 = vadd.f32 %v1220_v4, %v1170_v41  ;;  %v1289_v24 = vmul.f32 %v3110_v36, %v3150_v60  ;;  %v3176_v25 = vadd.f32 %v1072_v55, %v1037_v3  ;;  %v1038_v26 = vmul.f32 %v3073_v8, %v844_v22 }
 0x195   : > { %v1141_v27 = vmul.f32 %v3084_v14, %v1016_v23  ;;  %v1221_v28 = vmul.f32 %v3113_v38, %v844_v22  ;;  %v3182_v29 = vmul.f32 %v3119_v43, %v1016_v23  ;;  %v3184_v30 = vmax.f32 %v748_v16, 0.0 }
 0x196   : > { %v3186_v31 = vmax.f32 %v746_v18, 0.0  ;;  %v710_v32 = vmul.f32 %v2348_v2, %v3089_v15  ;;  %v1105_v33 = vadd.f32 %v1073_v13, %v1038_v26  ;;  %v708_v35 = vmul.f32 %v3089_v15, %v588_v12 }
 0x197   : > { %v1253_v34 = vadd.f32 %v1221_v28, %v1171_v46  ;;  %v2351_v37 = vpop.f32.mrb[8].mxu0  ;;  %v3191_v39 = vsel %vm839_vm0, %v845_v48, %v846_v58  ;;  %v3193_v41 = vadd.f32 %v1288_v57, %v1252_v21  ;;  %v851_v42 = vrot.slane %v3184_v30, 7 }
 0x198   : > { %v1078_v53 = vmul.f32 %v3071_v7, %v3184_v30  ;;  %v601_v55 = vpop.f32.mrb[9].mxu0  ;;  %v3199_v56 = vadd.f32 %v1141_v27, %v1105_v33  ;;  %v3205_v46 = vmul.f32 %v3110_v36, %v3184_v30  ;;  %v848_v48 = vrot.slane %v3186_v31, 7 }
 0x199   : > { %v3201_v61 = vadd.f32 %v1289_v24, %v1253_v34  ;;  %v2352_v57 = vpop.f32.mrb[10].mxu0  ;;  %v3209_v58 = vsel %vm839_vm0, 0.0, %v851_v42  ;;  %v1076_v0 = vmul.f32 %v3071_v7, %v3186_v31  ;;  %v749_v1 = vadd.f32 %v3100_v19, %v710_v32 }
 0x19a   : > { %4752 = vst [vmem:[#allocation21_spill] sm:$0xff] %v3205_v46  ;;  %v604_v2 = vpop.f32.mrb[11].mxu0  ;;  %v1043_v3 = vmul.f32 %v3073_v8, %v3209_v58  ;;  %v3218_v4 = vsel %vm839_vm0, 0.0, %v848_v48  ;;  %v3222_v5 = vmul.f32 %v3110_v36, %v3186_v31  ;;  %v747_v12 = vadd.f32 %v3100_v19, %v708_v35 }
 0x19b   : > { %v1041_v13 = vmul.f32 %v3073_v8, %v3218_v4  ;;  %v3227_v16 = vmax.f32 %v749_v1, 0.0  ;;  %v713_v18 = vmul.f32 %v2351_v37, %v3089_v15  ;;  %v711_v21 = vmul.f32 %v3089_v15, %v601_v55 }
 0x19c   : > { %v3231_v22 = vadd.f32 %v1078_v53, %v1043_v3  ;;  %v3235_v23 = vmul.f32 %v3113_v38, %v3209_v58  ;;  %v3237_v24 = vmax.f32 %v747_v12, 0.0  ;;  %v714_v26 = vmul.f32 %v2352_v57, %v3089_v15 }
 0x19d   : > { %v3240_v27 = vadd.f32 %v1076_v0, %v1041_v13  ;;  %v852_v28 = vrot.slane %v3227_v16, 7  ;;  %v712_v33 = vmul.f32 %v3089_v15, %v604_v2  ;;  %v1079_v34 = vmul.f32 %v3071_v7, %v3227_v16 }
 0x19e   : > { %4753 = vst [vmem:[#allocation22_spill] sm:$0xff] %v3235_v23  ;;  %v3249_v35 = vmul.f32 %v3110_v36, %v3227_v16  ;;  %v849_v37 = vrot.slane %v3237_v24, 7  ;;  %v1077_v0 = vmul.f32 %v3071_v7, %v3237_v24  ;;  %v752_v1 = vadd.f32 %v3100_v19, %v713_v18 }
 0x19f   : > { %v2355_v55 = vpop.f32.mrb[12].mxu0  ;;  %v3254_v57 = vsel %vm839_vm0, %v851_v42, %v852_v28  ;;  %v750_v2 = vadd.f32 %v3100_v19, %v711_v21  ;;  %v3267_v45 = vmul.f32 %v3110_v36, %v3237_v24  ;;  %v753_v42 = vadd.f32 %v3100_v19, %v714_v26 }
 0x1a0   : > { %4754 = vst [vmem:[#allocation23_spill] sm:$0xff] %v3249_v35  ;;  %v617_v3 = vpop.f32.mrb[13].mxu0  ;;  %v1044_v12 = vmul.f32 %v3073_v8, %v3254_v57  ;;  %v3263_v13 = vsel %vm839_vm0, %v848_v48, %v849_v37  ;;  %v3272_v32 = vmul.f32 %v3113_v38, %v3254_v57  ;;  %v3276_v21 = vmax.f32 %v752_v1, 0.0 }
 0x1a1   : > { %v2356_v28 = vpop.f32.mrb[14].mxu0  ;;  %v1042_v18 = vmul.f32 %v3073_v8, %v3263_v13  ;;  %v3278_v62 = vmax.f32 %v750_v2, 0.0  ;;  %v3282_v53 = vmax.f32 %v753_v42, 0.0  ;;  %v751_v54 = vadd.f32 %v3100_v19, %v712_v33 }
 0x1a2   : > { %4755 = vst [vmem:[#allocation24_spill] sm:$0xff] %v3272_v32  ;;  %4756 = vst [vmem:[#allocation25_spill] sm:$0xff] %v3276_v21  ;;  %v620_v48 = vpop.f32.mrb[15].mxu0  ;;  %v3280_v37 = vadd.f32 %v1079_v34, %v1044_v12  ;;  %v717_v26 = vmul.f32 %v2355_v55, %v3089_v15  ;;  %v857_v17 = vrot.slane %v3276_v21, 7  ;;  %v715_v1 = vmul.f32 %v3089_v15, %v617_v3 }
 0x1a3   : > { %4757 = vst [vmem:[#allocation26_spill] sm:$0xff] %v3278_v62  ;;  %4758 = vst [vmem:[#allocation27_spill] sm:$0xff] %v3282_v53  ;;  %v3286_v9 = vadd.f32 %v1077_v0, %v1042_v18  ;;  %v1082_v2 = vmul.f32 %v3071_v7, %v3276_v21  ;;  %v3295_v34 = vmul.f32 %v3110_v36, %v3276_v21  ;;  %v854_v12 = vrot.slane %v3278_v62, 7 }
 0x1a4   : > { %v3300_v55 = vsel %vm839_vm0, 0.0, %v857_v17  ;;  %v1080_v0 = vmul.f32 %v3071_v7, %v3278_v62  ;;  %v3306_v3 = vmul.f32 %v3110_v36, %v3278_v62  ;;  %v858_v42 = vrot.slane %v3282_v53, 7 }
 0x1a5   : > { %4759 = vst [vmem:[#allocation28_spill] sm:$0xff] %v3295_v34  ;;  %4760 = vst [vmem:[#allocation29_spill] sm:$0xff] %v3300_v55  ;;  %v1047_v18 = vmul.f32 %v3073_v8, %v3300_v55  ;;  %v3313_v11 = vmul.f32 %v3113_v38, %v3300_v55  ;;  %v3316_v33 = vsel %vm839_vm0, 0.0, %v854_v12  ;;  %v1083_v55 = vmul.f32 %v3071_v7, %v3282_v53 }
 0x1a6   : > { %4761 = vst [vmem:[#allocation30_spill] sm:$0xff] %v3306_v3  ;;  %4763 = vst [vmem:[#allocation32_spill] sm:$0xff] %v3316_v33  ;;  %v1045_v34 = vmul.f32 %v3073_v8, %v3316_v33  ;;  %v3323_v3 = vmul.f32 %v3113_v38, %v3316_v33  ;;  %v3326_v21 = vsel %vm839_vm0, %v857_v17, %v858_v42  ;;  %v3338_v32 = vmax.f32 %v751_v54, 0.0 }
 0x1a7   : > { %4762 = vst [vmem:[#allocation31_spill] sm:$0xff] %v3313_v11  ;;  %v2359_v10 = vpop.f32.mrb[16].mxu0  ;;  %4765 = vst [vmem:[#allocation34_spill] sm:$0xff] %v3326_v21  ;;  %v3330_v35 = vadd.f32 %v1082_v2, %v1047_v18  ;;  %v1048_v6 = vmul.f32 %v3073_v8, %v3326_v21  ;;  %v3336_v46 = vmul.f32 %v3110_v36, %v3282_v53 }
 0x1a8   : > { %4764 = vst [vmem:[#allocation33_spill] sm:$0xff] %v3323_v3  ;;  %v633_v11 = vpop.f32.mrb[17].mxu0  ;;  %4768 = vst [vmem:[#allocation37_spill] sm:$0xff] %v3338_v32  ;;  %v3342_v17 = vmul.f32 %v3113_v38, %v3326_v21  ;;  %v756_v42 = vadd.f32 %v3100_v19, %v717_v26  ;;  %v754_v3 = vadd.f32 %v3100_v19, %v715_v1 }
 0x1a9   : > { %4766 = vst [vmem:[#allocation35_spill] sm:$0xff] %v3330_v35  ;;  %4767 = vst [vmem:[#allocation36_spill] sm:$0xff] %v3336_v46  ;;  %v2360_v33 = vpop.f32.mrb[18].mxu0  ;;  %v718_v2 = vmul.f32 %v2356_v28, %v3089_v15  ;;  %v3347_v35 = vadd.f32 %v1080_v0, %v1045_v34  ;;  %v3349_v23 = vadd.f32 %v1083_v55, %v1048_v6  ;;  %v855_v46 = vrot.slane %v3338_v32, 7 }
 0x1aa   : > { %4769 = vst [vmem:[#allocation38_spill] sm:$0xff] %v3342_v17  ;;  %v636_v18 = vpop.f32.mrb[19].mxu0  ;;  %v1081_v53 = vmul.f32 %v3071_v7, %v3338_v32  ;;  %v3357_v17 = vmul.f32 %v3110_v36, %v3338_v32  ;;  %v3359_v26 = vmax.f32 %v756_v42, 0.0  ;;  %v3361_v1 = vmax.f32 %v754_v3, 0.0 }
 0x1ab   : > { %4770 = vst [vmem:[#allocation39_spill] sm:$0xff] %v3347_v35  ;;  %4771 = vst [vmem:[#allocation40_spill] sm:$0xff] %v3349_v23  ;;  %v3364_v28 = vsel %vm839_vm0, %v854_v12, %v855_v46  ;;  %v757_v6 = vadd.f32 %v3100_v19, %v718_v2  ;;  %v716_v34 = vmul.f32 %v3089_v15, %v620_v48 }
 0x1ac   : > { %4772 = vst [vmem:[#allocation41_spill] sm:$0xff] %v3357_v17  ;;  %4773 = vst [vmem:[#allocation42_spill] sm:$0xff] %v3359_v26  ;;  %v721_v55 = vmul.f32 %v2359_v10, %v3089_v15  ;;  %v1046_v0 = vmul.f32 %v3073_v8, %v3364_v28  ;;  %v3373_v54 = vmul.f32 %v3113_v38, %v3364_v28  ;;  %v863_v42 = vrot.slane %v3359_v26, 7 }
 0x1ad   : > { %4774 = vst [vmem:[#allocation43_spill] sm:$0xff] %v3361_v1  ;;  %4775 = vst [vmem:[#allocation44_spill] sm:$0xff] %v3364_v28  ;;  %v719_v3 = vmul.f32 %v3089_v15, %v633_v11  ;;  %v1086_v12 = vmul.f32 %v3071_v7, %v3359_v26  ;;  %v3382_v48 = vmul.f32 %v3110_v36, %v3359_v26  ;;  %v860_v10 = vrot.slane %v3361_v1, 7 }
 0x1ae   : > { %4776 = vst [vmem:[#allocation45_spill] sm:$0xff] %v3373_v54  ;;  %v3387_v21 = vadd.f32 %v1081_v53, %v1046_v0  ;;  %v3390_v17 = vsel %vm839_vm0, 0.0, %v863_v42  ;;  %v1084_v46 = vmul.f32 %v3071_v7, %v3361_v1  ;;  %v3404_v53 = vmul.f32 %v3110_v36, %v3361_v1 }
 0x1af   : > { %4777 = vst [vmem:[#allocation46_spill] sm:$0xff] %v3382_v48  ;;  %v3385_v2 = vpop.f32.mrb[20].mxu0  ;;  %4779 = vst [vmem:[#allocation48_spill] sm:$0xff] %v3390_v17  ;;  %v1051_v26 = vmul.f32 %v3073_v8, %v3390_v17  ;;  %v3400_v48 = vsel %vm839_vm0, 0.0, %v860_v10  ;;  %v3406_v0 = vmax.f32 %v757_v6, 0.0  ;;  %v3412_v11 = vmul.f32 %v3113_v38, %v3390_v17 }
 0x1b0   : > { %4778 = vst [vmem:[#allocation47_spill] sm:$0xff] %v3387_v21  ;;  %v3395_v23 = vpop.f32.mrb[21].mxu0  ;;  %4780 = vst [vmem:[#allocation49_spill] sm:$0xff] %v3400_v48  ;;  %v1049_v28 = vmul.f32 %v3073_v8, %v3400_v48  ;;  %v755_v21 = vadd.f32 %v3100_v19, %v716_v34  ;;  %v760_v35 = vadd.f32 %v3100_v19, %v721_v55 }
 0x1b1   : > { %4781 = vst [vmem:[#allocation50_spill] sm:$0xff] %v3404_v53  ;;  %4782 = vst [vmem:[#allocation51_spill] sm:$0xff] %v3406_v0  ;;  %v3408_v54 = vpop.f32.mrb[22].mxu0  ;;  %v3420_v32 = vadd.f32 %v1086_v12, %v1051_v26  ;;  %v3424_v6 = vmul.f32 %v3113_v38, %v3400_v48  ;;  %v864_v53 = vrot.slane %v3406_v0, 7  ;;  %v1087_v1 = vmul.f32 %v3071_v7, %v3406_v0 }
 0x1b2   : > { %4783 = vst [vmem:[#allocation52_spill] sm:$0xff] %v3412_v11  ;;  %v3418_v62 = vpop.f32.mrb[23].mxu0  ;;  %v3428_v11 = vadd.f32 %v1084_v46, %v1049_v28  ;;  %v3432_v34 = vmax.f32 %v755_v21, 0.0  ;;  %v3434_v55 = vmax.f32 %v760_v35, 0.0  ;;  %v3441_v12 = vmul.f32 %v3110_v36, %v3406_v0 }
 0x1b3   : > { %4784 = vst [vmem:[#allocation53_spill] sm:$0xff] %v3420_v32  ;;  %4785 = vst [vmem:[#allocation54_spill] sm:$0xff] %v3424_v6  ;;  %v3437_v26 = vsel %vm839_vm0, %v863_v42, %v864_v53  ;;  %v758_v32 = vadd.f32 %v3100_v19, %v719_v3  ;;  %v722_v17 = vmul.f32 %v2360_v33, %v3089_v15 }
 0x1b4   : > { %4786 = vst [vmem:[#allocation55_spill] sm:$0xff] %v3428_v11  ;;  %4787 = vst [vmem:[#allocation56_spill] sm:$0xff] %v3432_v34  ;;  %v1052_v28 = vmul.f32 %v3073_v8, %v3437_v26  ;;  %v3449_v21 = vmul.f32 %v3113_v38, %v3437_v26  ;;  %v861_v35 = vrot.slane %v3432_v34, 7  ;;  %v720_v42 = vmul.f32 %v3089_v15, %v636_v18 }
 0x1b5   : > { %4788 = vst [vmem:[#allocation57_spill] sm:$0xff] %v3434_v55  ;;  %4789 = vst [vmem:[#allocation58_spill] sm:$0xff] %v3437_v26  ;;  %v1085_v53 = vmul.f32 %v3071_v7, %v3432_v34  ;;  %v3458_v3 = vmul.f32 %v3110_v36, %v3432_v34  ;;  %v869_v33 = vrot.slane %v3434_v55, 7  ;;  %v1090_v46 = vmul.f32 %v3071_v7, %v3434_v55 }
 0x1b6   : > { %4790 = vst [vmem:[#allocation59_spill] sm:$0xff] %v3441_v12  ;;  %4791 = vst [vmem:[#allocation60_spill] sm:$0xff] %v3449_v21  ;;  %v3463_v6 = vadd.f32 %v1087_v1, %v1052_v28  ;;  %v3466_v21 = vsel %vm839_vm0, %v860_v10, %v861_v35  ;;  %v3480_v1 = vmul.f32 %v3110_v36, %v3434_v55  ;;  %v3482_v28 = vmax.f32 %v758_v32, 0.0 }
 0x1b7   : > { %4792 = vst [vmem:[#allocation61_spill] sm:$0xff] %v3458_v3  ;;  %v3461_v12 = vpop.f32.mrb[24].mxu0  ;;  %4794 = vst [vmem:[#allocation63_spill] sm:$0xff] %v3466_v21  ;;  %v1050_v0 = vmul.f32 %v3073_v8, %v3466_v21  ;;  %v3476_v3 = vsel %vm839_vm0, 0.0, %v869_v33  ;;  %v3488_v35 = vmul.f32 %v3113_v38, %v3466_v21  ;;  %v759_v48 = vadd.f32 %v3100_v19, %v720_v42 }
 0x1b8   : > { %4793 = vst [vmem:[#allocation62_spill] sm:$0xff] %v3463_v6  ;;  %v3471_v26 = vpop.f32.mrb[25].mxu0  ;;  %4795 = vst [vmem:[#allocation64_spill] sm:$0xff] %v3476_v3  ;;  %v1055_v18 = vmul.f32 %v3073_v8, %v3476_v3  ;;  %v761_v6 = vadd.f32 %v3100_v19, %v722_v17  ;;  %v3500_v32 = vmul.f32 %v3113_v38, %v3476_v3  ;;  %v4808_v55 = vrot.slane %v3121_v44, 1 }
 0x1b9   : > { %4796 = vst [vmem:[#allocation65_spill] sm:$0xff] %v3480_v1  ;;  %4797 = vst [vmem:[#allocation66_spill] sm:$0xff] %v3482_v28  ;;  %v3484_v10 = vpop.f32.mrb[26].mxu0  ;;  %v3496_v34 = vadd.f32 %v1085_v53, %v1050_v0  ;;  %v866_v1 = vrot.slane %v3482_v28, 7  ;;  %v1088_v21 = vmul.f32 %v3071_v7, %v3482_v28  ;;  %v3510_v42 = vmax.f32 %v759_v48, 0.0 }
 0x1ba   : > { %4798 = vst [vmem:[#allocation67_spill] sm:$0xff] %v3488_v35  ;;  %v3494_v11 = vpop.f32.mrb[27].mxu0  ;;  %4801 = vst [vmem:[#allocation70_spill] sm:$0xff] %v3500_v32  ;;  %v3504_v35 = vadd.f32 %v1090_v46, %v1055_v18  ;;  %v3508_v17 = vmax.f32 %v761_v6, 0.0  ;;  %v3517_v53 = vmul.f32 %v3110_v36, %v3482_v28  ;;  %v4807_v32 = vrot.slane %v3150_v60, 1 }
 0x1bb   : > { %4799 = vst [vmem:[#allocation68_spill] sm:$0xff] %v3494_v11  ;;  %4800 = vst [vmem:[#allocation69_spill] sm:$0xff] %v3496_v34  ;;  %v3513_v0 = vsel %vm839_vm0, 0.0, %v866_v1  ;;  %v942_v18 = vrot.slane %v3131_v50, 1 }
 0x1bc   : > { %4802 = vst [vmem:[#allocation71_spill] sm:$0xff] %v3504_v35  ;;  %4803 = vst [vmem:[#allocation72_spill] sm:$0xff] %v3508_v17  ;;  %v940_v46 = vsel %vm935_vm1, %v4808_v55, %v4807_v32  ;;  %v1053_v6 = vmul.f32 %v3073_v8, %v3513_v0  ;;  %v3529_v48 = vmul.f32 %v3113_v38, %v3513_v0  ;;  %v870_v3 = vrot.slane %v3508_v17, 7 }
 0x1bd   : > { %4804 = vst [vmem:[#allocation73_spill] sm:$0xff] %v3510_v42  ;;  %4805 = vst [vmem:[#allocation74_spill] sm:$0xff] %v3513_v0  ;;  %v941_v35 = vrot.slane %v3116_v40, 1  ;;  %v1091_v44 = vmul.f32 %v3071_v7, %v3508_v17  ;;  %v3538_v60 = vmul.f32 %v3110_v36, %v3508_v17  ;;  %v867_v55 = vrot.slane %v3510_v42, 7 }
 0x1be   : > { %4806 = vst [vmem:[#allocation75_spill] sm:$0xff] %v3517_v53  ;;  %4809 = vst [vmem:[#allocation76_spill] sm:$0xff] %v3529_v48  ;;  %v3543_v28 = vadd.f32 %v1088_v21, %v1053_v6  ;;  %v3546_v48 = vsel %vm839_vm0, %v869_v33, %v870_v3  ;;  %v1089_v53 = vmul.f32 %v3071_v7, %v3510_v42 }
 0x1bf   : > { %4810 = vst [vmem:[#allocation77_spill] sm:$0xff] %v3538_v60  ;;  %v3541_v32 = vpop.f32.mrb[28].mxu0  ;;  %4813 = vst [vmem:[#allocation80_spill] sm:$0xff] %v3546_v48  ;;  %v1056_v17 = vmul.f32 %v3073_v8, %v3546_v48  ;;  %v3556_v60 = vsel %vm839_vm0, %v866_v1, %v867_v55  ;;  %v3560_v21 = vmul.f32 %v3110_v36, %v3510_v42 }
 0x1c0   : > { %4811 = vst [vmem:[#allocation78_spill] sm:$0xff] %v3541_v32  ;;  %4812 = vst [vmem:[#allocation79_spill] sm:$0xff] %v3543_v28  ;;  %v3551_v34 = vpop.f32.mrb[29].mxu0  ;;  %v943_v3 = vsel %vm935_vm1, %v941_v35, %v942_v18  ;;  %v3567_v6 = vmul.f32 %v3113_v38, %v3546_v48  ;;  %v1054_v0 = vmul.f32 %v3073_v8, %v3556_v60  ;;  %v1017_v28 = vsel %vm935_vm1, %v942_v18, 0.0 }
 0x1c1   : > { %4814 = vst [vmem:[#allocation81_spill] sm:$0xff] %v3551_v34  ;;  %4815 = vst [vmem:[#allocation82_spill] sm:$0xff] %v3560_v21  ;;  %v3563_v33 = vpop.f32.mrb[30].mxu0  ;;  %v1039_v1 = vmul.f32 %v3073_v8, %v3168_v20  ;;  %v3576_v42 = vadd.f32 %v1091_v44, %v1056_v17  ;;  %v1040_v35 = vmul.f32 %v3073_v8, %v3191_v39 }
 0x1c2   : > { %4816 = vst [vmem:[#allocation83_spill] sm:$0xff] %v3563_v33  ;;  %4817 = vst [vmem:[#allocation84_spill] sm:$0xff] %v3567_v6  ;;  %v3574_v55 = vpop.f32.mrb[31].mxu0  ;;  %v1140_v21 = vmul.f32 %v3084_v14, %v940_v46  ;;  %v1142_v48 = vmul.f32 %v3084_v14, %v943_v3  ;;  %v3582_v6 = vadd.f32 %v1089_v53, %v1054_v0 }
 0x1c3   : > { %4818 = vst [vmem:[#allocation85_spill] sm:$0xff] %v3574_v55  ;;  %4819 = vst [vmem:[#allocation86_spill] sm:$0xff] %v3576_v42  ;;  %v1106_v33 = vadd.f32 %v3129_v49, %v1039_v1  ;;  %v1143_v18 = vmul.f32 %v3084_v14, %v1017_v28  ;;  %v1222_v34 = vmul.f32 %v3113_v38, %v3168_v20 }
 0x1c4   : > { %4820 = vst [vmem:[#allocation87_spill] sm:$0xff] %v3582_v6  ;;  %v1107_v55 = vadd.f32 %v3148_v59, %v1040_v35  ;;  %v1172_v17 = vadd.f32 %v1140_v21, %v3176_v25  ;;  %v1223_v44 = vmul.f32 %v3113_v38, %v3191_v39  ;;  %v1224_v42 = vmul.f32 %v3113_v38, %v3218_v4  ;;  %v3600_v21 = vld [vmem:[#allocation7 + $0x8] ss:$0 sm:$0xff] }
 0x1c5   : > { %v1174_v32 = vadd.f32 %v1142_v48, %v1106_v33  ;;  %v1225_v0 = vmul.f32 %v3113_v38, %v3263_v13  ;;  %v1356_v49 = vmul.f32 %v3119_v43, %v940_v46  ;;  %v1358_v53 = vmul.f32 %v3119_v43, %v943_v3 }
 0x1c6   : > { %v1175_v1 = vadd.f32 %v1143_v18, %v1107_v55  ;;  %v1254_v6 = vadd.f32 %v1222_v34, %v1172_v17  ;;  %v1255_v59 = vadd.f32 %v1223_v44, %v3199_v56  ;;  %v1359_v25 = vmul.f32 %v3119_v43, %v1017_v28 }
 0x1c7   : > { %v3602_v35 = vadd.f32 %v1224_v42, %v1174_v32  ;;  %v1388_v11 = vadd.f32 %v1356_v49, %v3193_v41  ;;  %v1389_v48 = vadd.f32 %v3182_v29, %v3201_v61  ;;  %v1424_v46 = vmul.f32 %v3124_v47, %v3168_v20 }
 0x1c8   : > { %v3609_v33 = vadd.f32 %v1225_v0, %v1175_v1  ;;  %v1322_v34 = vadd.f32 %v3137_v52, %v1254_v6  ;;  %v1323_v56 = vadd.f32 %v3155_v63, %v1255_v59  ;;  %v1425_v55 = vmul.f32 %v3124_v47, %v3191_v39 }
 0x1c9   : > { %v3617_v42 = vmul.f32 %v3113_v38, %v3556_v60  ;;  %v1456_v41 = vadd.f32 %v1424_v46, %v1388_v11  ;;  %v1492_v29 = vmul.f32 %v3133_v51, %v3116_v40  ;;  %v1493_v20 = vmul.f32 %v3133_v51, %v3131_v50 }
 0x1ca   : > { %v1390_v61 = vadd.f32 %v1358_v53, %v1322_v34  ;;  %v1391_v32 = vadd.f32 %v1359_v25, %v1323_v56  ;;  %v1457_v18 = vadd.f32 %v1425_v55, %v1389_v48  ;;  %v1559_v52 = vmul.f32 %v3600_v21, %v943_v3  ;;  %v3638_v3 = vld [vmem:[%s4655_s5] ss:$0 sm:$0xff] }
 0x1cb   : > { %v1523_v63 = vadd.f32 %v1492_v29, %v1456_v41  ;;  %v4821_v6 = vrot.slane %v3237_v24, 1  ;;  %v4822_v39 = vrot.slane %v3186_v31, 1  ;;  %v1426_v40 = vmul.f32 %v3124_v47, %v3218_v4 }
 0x1cc   : > { %v1524_v50 = vadd.f32 %v1493_v20, %v1457_v18  ;;  %v1560_v0 = vmul.f32 %v3600_v21, %v1017_v28  ;;  %v1427_v25 = vmul.f32 %v3124_v47, %v3263_v13  ;;  %v3650_v28 = vld [vmem:[%s4656_s6] ss:$0 sm:$0xff]  ;;  %v1494_v56 = vmul.f32 %v3133_v51, %v3186_v31 }
 0x1cd   : > { %v946_v17 = vsel %vm935_vm1, %v4822_v39, %v4821_v6  ;;  %v4823_v11 = vmov %v4821_v6  ;;  %v1591_v1 = vadd.f32 %v1559_v52, %v1523_v63  ;;  %v1458_v4 = vadd.f32 %v1426_v40, %v1390_v61 }
 0x1ce   : > { %v1018_v44 = vsel %vm935_vm1, %v4823_v11, 0.0  ;;  %v1144_v49 = vmul.f32 %v3084_v14, %v946_v17  ;;  %v3643_v59 = vmul.f32 %v3119_v43, %v946_v17  ;;  %v1592_v48 = vadd.f32 %v1560_v0, %v1524_v50 }
 0x1cf   : > { %v1145_v53 = vmul.f32 %v3084_v14, %v1018_v44  ;;  %v1630_v55 = vmul.f32 %v3638_v3, %v1591_v1  ;;  %v1459_v41 = vadd.f32 %v1427_v25, %v1391_v32  ;;  %v1495_v13 = vmul.f32 %v3133_v51, %v3237_v24 }
 0x1d0   : > { %v3653_v46 = vadd.f32 %v1144_v49, %v3240_v27  ;;  %v1561_v29 = vmul.f32 %v3600_v21, %v946_v17  ;;  %v1631_v20 = vmul.f32 %v3638_v3, %v1592_v48  ;;  %v1525_v61 = vadd.f32 %v1494_v56, %v1458_v4 }
 0x1d1   : > { %v3656_v34 = vadd.f32 %v1145_v53, %v3286_v9  ;;  %v1562_v27 = vmul.f32 %v3600_v21, %v1018_v44  ;;  %v725_v9 = vmul.f32 %v3385_v2, %v3089_v15  ;;  %v1669_v18 = vadd.f32 %v3650_v28, %v1630_v55 }
 0x1d2   : > { %v1526_v52 = vadd.f32 %v1495_v13, %v1459_v41  ;;  %v723_v31 = vmul.f32 %v3089_v15, %v3395_v23  ;;  %v726_v32 = vmul.f32 %v3408_v54, %v3089_v15  ;;  %v1670_v24 = vadd.f32 %v3650_v28, %v1631_v20 }
 0x1d3   : > { %v1593_v63 = vadd.f32 %v1561_v29, %v1525_v61  ;;  %v764_v6 = vadd.f32 %v3100_v19, %v725_v9  ;;  %v724_v39 = vmul.f32 %v3089_v15, %v3418_v62  ;;  %v3678_v17 = vmul.f32 %v3119_v43, %v1018_v44 }
 0x1d4   : > { %v1594_v2 = vadd.f32 %v1562_v27, %v1526_v52  ;;  %v762_v11 = vadd.f32 %v3100_v19, %v723_v31  ;;  %v765_v40 = vadd.f32 %v3100_v19, %v726_v32  ;;  %v1701_v23 = vmax.f32 %v1669_v18, 0.0 }
 0x1d5   : > { %v1702_v50 = vmax.f32 %v1670_v24, 0.0  ;;  %v1632_v54 = vmul.f32 %v3638_v3, %v1593_v63  ;;  %v3683_v0 = vmax.f32 %v764_v6, 0.0  ;;  %v763_v62 = vadd.f32 %v3100_v19, %v724_v39 }
 0x1d6   : > { %v1633_v49 = vmul.f32 %v3638_v3, %v1594_v2  ;;  %v3686_v53 = vmax.f32 %v762_v11, 0.0  ;;  %v4824_v44 = vrot.slane %v3227_v16, 1  ;;  %v4825_v1 = vrot.slane %v3184_v30, 1 }
 0x1d7   : > { %v1733_v4 = vpack.c.bf16 %v1702_v50, %v1701_v23  ;;  %v1671_v48 = vadd.f32 %v3650_v28, %v1632_v54  ;;  %v875_v56 = vrot.slane %v3683_v0, 7  ;;  %v3696_v55 = vmax.f32 %v765_v40, 0.0 }
 0x1d8   : > { %v949_v25 = vsel %vm935_vm1, %v4825_v1, %v4824_v44  ;;  %v1672_v41 = vadd.f32 %v3650_v28, %v1633_v49  ;;  %v1094_v29 = vmul.f32 %v3071_v7, %v3683_v0  ;;  %v872_v20 = vrot.slane %v3686_v53, 7 }
 0x1d9   : > { %2389 = vmatprep.mubr.bf16.mxu1 %v1733_v4  ;;  %v1703_v61 = vmax.f32 %v1671_v48, 0.0  ;;  %v3704_v27 = vsel %vm839_vm0, 0.0, %v875_v56  ;;  %v3708_v9 = vmul.f32 %v3110_v36, %v3683_v0  ;;  %v1092_v24 = vmul.f32 %v3071_v7, %v3686_v53 }
 0x1da   : > { %4826 = vst [vmem:[#allocation88_spill] sm:$0xff] %v3704_v27  ;;  %v1704_v52 = vmax.f32 %v1672_v41, 0.0  ;;  %v1059_v31 = vmul.f32 %v3073_v8, %v3704_v27  ;;  %v3714_v32 = vsel %vm839_vm0, 0.0, %v872_v20  ;;  %v3720_v63 = vmul.f32 %v3113_v38, %v3704_v27 }
 0x1db   : > { %4827 = vst [vmem:[#allocation89_spill] sm:$0xff] %v3708_v9  ;;  %v1057_v6 = vmul.f32 %v3073_v8, %v3714_v32  ;;  %v3726_v39 = vmul.f32 %v3113_v38, %v3714_v32  ;;  %v876_v2 = vrot.slane %v3696_v55, 7  ;;  %v3733_v23 = vmul.f32 %v3110_v36, %v3686_v53 }
 0x1dc   : > { %4828 = vst [vmem:[#allocation90_spill] sm:$0xff] %v3720_v63  ;;  %v1734_v11 = vpack.c.bf16 %v1704_v52, %v1703_v61  ;;  %v3729_v40 = vadd.f32 %v1094_v29, %v1059_v31  ;;  %v1095_v44 = vmul.f32 %v3071_v7, %v3696_v55  ;;  %v3743_v1 = vmax.f32 %v763_v62, 0.0  ;;  %v4835_v52 = vld [vmem:[#allocation37_spill] sm:$0xff] }
 0x1dd   : > { %4829 = vst [vmem:[#allocation91_spill] sm:$0xff] %v3733_v23  ;;  %v3736_v54 = vadd.f32 %v1092_v24, %v1057_v6  ;;  %v3739_v49 = vsel %vm839_vm0, %v875_v56, %v876_v2  ;;  %v3749_v48 = vmul.f32 %v3110_v36, %v3696_v55  ;;  %v4832_v41 = vrot.slane %v3227_v16, 1 }
 0x1de   : > { %4830 = vst [vmem:[#allocation92_spill] sm:$0xff] %v3739_v49  ;;  %2390 = vmatmul.mubr.bf16.vlgmr.msra.gmra.mrb[0].mxu1 %v1734_v11  ;;  %v1060_v4 = vmul.f32 %v3073_v8, %v3739_v49  ;;  %v1146_v56 = vmul.f32 %v3084_v14, %v949_v25  ;;  %v3757_v61 = vmul.f32 %v3113_v38, %v3739_v49  ;;  %v873_v62 = vrot.slane %v3743_v1, 7  ;;  %v4844_v49 = vld [vmem:[#allocation21_spill] sm:$0xff] }
 0x1df   : > { %4831 = vst [vmem:[#allocation93_spill] sm:$0xff] %v3749_v48  ;;  %v1019_v29 = vsel %vm935_vm1, %v4832_v41, 0.0  ;;  %v1093_v31 = vmul.f32 %v3071_v7, %v3743_v1  ;;  %v1324_v11 = vadd.f32 %v3222_v5, %v3602_v35  ;;  %v3776_v13 = vmul.f32 %v3110_v36, %v3743_v1 }
 0x1e0   : > { %4833 = vst [vmem:[#allocation94_spill] sm:$0xff] %v3757_v61  ;;  %v3763_v24 = vadd.f32 %v1095_v44, %v1060_v4  ;;  %v1147_v6 = vmul.f32 %v3084_v14, %v1019_v29  ;;  %v3767_v2 = vadd.f32 %v1146_v56, %v3231_v22  ;;  %v3772_v41 = vsel %vm839_vm0, %v872_v20, %v873_v62 }
 0x1e1   : > { %4834 = vst [vmem:[#allocation95_spill] sm:$0xff] %v3776_v13  ;;  %v1325_v50 = vadd.f32 %v3267_v45, %v3609_v33  ;;  %v1362_v44 = vmul.f32 %v3119_v43, %v949_v25  ;;  %v1058_v4 = vmul.f32 %v3073_v8, %v3772_v41  ;;  %v1363_v5 = vmul.f32 %v3119_v43, %v1019_v29  ;;  %v4845_v13 = vld [vmem:[#allocation23_spill] sm:$0xff] }
 0x1e2   : > { %v3784_v22 = vadd.f32 %v1147_v6, %v3280_v37  ;;  %v1392_v35 = vadd.f32 %v3643_v59, %v1324_v11  ;;  %v3790_v20 = vmul.f32 %v3113_v38, %v3772_v41  ;;  %v1428_v45 = vmul.f32 %v3124_v47, %v3209_v58 }
 0x1e3   : > { %v1393_v56 = vadd.f32 %v3678_v17, %v1325_v50  ;;  %v1429_v33 = vmul.f32 %v3124_v47, %v3254_v57  ;;  %v3797_v62 = vadd.f32 %v1093_v31, %v1058_v4  ;;  %v1496_v37 = vmul.f32 %v3133_v51, %v3184_v30  ;;  %v4837_v50 = vld [vmem:[#allocation26_spill] sm:$0xff] }
 0x1e4   : > { %v1497_v59 = vmul.f32 %v3133_v51, %v3227_v16  ;;  %v1563_v6 = vmul.f32 %v3600_v21, %v949_v25  ;;  %v1460_v11 = vadd.f32 %v1428_v45, %v1392_v35  ;;  %v4836_v17 = vrot.slane %v4835_v52, 1  ;;  %v4840_v16 = vld [vmem:[#allocation22_spill] sm:$0xff]  ;;  %v4841_v25 = vld [vmem:[#allocation24_spill] sm:$0xff] }
 0x1e5   : > { %v1461_v18 = vadd.f32 %v1429_v33, %v1393_v56  ;;  %v4838_v48 = vrot.slane %v4837_v50, 1  ;;  %v1258_v9 = vadd.f32 %v4840_v16, %v3653_v46  ;;  %v1259_v35 = vadd.f32 %v4841_v25, %v3656_v34  ;;  %v4846_v34 = vld [vmem:[#allocation32_spill] sm:$0xff] }
 0x1e6   : > { %v4839_v57 = vmov %v4836_v17  ;;  %v1527_v56 = vadd.f32 %v1496_v37, %v1460_v11  ;;  %v1564_v33 = vmul.f32 %v3600_v21, %v1019_v29  ;;  %v4847_v37 = vld [vmem:[#allocation44_spill] sm:$0xff] }
 0x1e7   : > { %v952_v58 = vsel %vm935_vm1, %v4838_v48, %v4836_v17  ;;  %v1020_v31 = vsel %vm935_vm1, %v4839_v57, 0.0  ;;  %v1528_v45 = vadd.f32 %v1497_v59, %v1461_v18  ;;  %v4842_v17 = vld [vmem:[#allocation39_spill] sm:$0xff]  ;;  %v1326_v27 = vadd.f32 %v4844_v49, %v1258_v9 }
 0x1e8   : > { %v1148_v4 = vmul.f32 %v3084_v14, %v952_v58  ;;  %v1149_v30 = vmul.f32 %v3084_v14, %v1020_v31  ;;  %v3820_v48 = vmul.f32 %v3119_v43, %v952_v58  ;;  %v4843_v57 = vld [vmem:[#allocation47_spill] sm:$0xff]  ;;  %v1327_v46 = vadd.f32 %v4845_v13, %v1259_v35 }
 0x1e9   : > { %v1595_v16 = vadd.f32 %v1563_v6, %v1527_v56  ;;  %v1596_v23 = vadd.f32 %v1564_v33, %v1528_v45  ;;  %v1430_v18 = vmul.f32 %v3124_v47, %v4846_v34  ;;  %v1431_v29 = vmul.f32 %v3124_v47, %v4847_v37 }
 0x1ea   : > { %v3823_v61 = vadd.f32 %v1148_v4, %v4842_v17  ;;  %v3826_v63 = vadd.f32 %v1149_v30, %v4843_v57  ;;  %v1394_v59 = vadd.f32 %v1362_v44, %v1326_v27  ;;  %v1395_v11 = vadd.f32 %v1363_v5, %v1327_v46 }
 0x1eb   : > { %v1498_v4 = vmul.f32 %v3133_v51, %v4837_v50  ;;  %v1499_v30 = vmul.f32 %v3133_v51, %v4835_v52  ;;  %v1634_v9 = vmul.f32 %v3638_v3, %v1595_v16  ;;  %v1635_v13 = vmul.f32 %v3638_v3, %v1596_v23  ;;  %v4848_v23 = vld [vmem:[#allocation68_spill] sm:$0xff] }
 0x1ec   : > { %v1565_v49 = vmul.f32 %v3600_v21, %v952_v58  ;;  %v1566_v6 = vmul.f32 %v3600_v21, %v1020_v31  ;;  %v1462_v25 = vadd.f32 %v1430_v18, %v1394_v59  ;;  %v1463_v35 = vadd.f32 %v1431_v29, %v1395_v11  ;;  %v4851_v59 = vld [vmem:[#allocation27_spill] sm:$0xff] }
 0x1ed   : > { %v729_v27 = vmul.f32 %v3461_v12, %v3089_v15  ;;  %v727_v44 = vmul.f32 %v3089_v15, %v3471_v26  ;;  %v1673_v5 = vadd.f32 %v3650_v28, %v1634_v9  ;;  %v1674_v52 = vadd.f32 %v3650_v28, %v1635_v13 }
 0x1ee   : > { %v730_v50 = vmul.f32 %v3484_v10, %v3089_v15  ;;  %v728_v58 = vmul.f32 %v3089_v15, %v4848_v23  ;;  %v1529_v56 = vadd.f32 %v1498_v4, %v1462_v25  ;;  %v1530_v45 = vadd.f32 %v1499_v30, %v1463_v35  ;;  %v4853_v4 = vld [vmem:[#allocation25_spill] sm:$0xff] }
 0x1ef   : > { %v768_v33 = vadd.f32 %v3100_v19, %v729_v27  ;;  %v766_v17 = vadd.f32 %v3100_v19, %v727_v44  ;;  %v1705_v12 = vmax.f32 %v1673_v5, 0.0  ;;  %v1706_v57 = vmax.f32 %v1674_v52, 0.0 }
 0x1f0   : > { %v769_v26 = vadd.f32 %v3100_v19, %v730_v50  ;;  %v767_v46 = vadd.f32 %v3100_v19, %v728_v58  ;;  %v1597_v16 = vadd.f32 %v1565_v49, %v1529_v56  ;;  %v1598_v34 = vadd.f32 %v1566_v6, %v1530_v45  ;;  %v4871_v50 = vld [vmem:[#allocation45_spill] sm:$0xff] }
 0x1f1   : > { %v3856_v18 = vmax.f32 %v768_v33, 0.0  ;;  %v3858_v10 = vmax.f32 %v766_v17, 0.0  ;;  %v1735_v37 = vpack.c.bf16 %v1706_v57, %v1705_v12  ;;  %v1365_v15 = vmul.f32 %v3119_v43, %v1020_v31 }
 0x1f2   : > { %v3861_v29 = vmax.f32 %v769_v26, 0.0  ;;  %v4852_v11 = vrot.slane %v4851_v59, 1  ;;  %v4854_v30 = vrot.slane %v4853_v4, 1  ;;  %v1636_v13 = vmul.f32 %v3638_v3, %v1597_v16 }
 0x1f3   : > { %4849 = vst [vmem:[#allocation37_spill] sm:$0xff] %v3856_v18  ;;  %v1637_v19 = vmul.f32 %v3638_v3, %v1598_v34  ;;  %v881_v49 = vrot.slane %v3856_v18, 7  ;;  %v3871_v6 = vmax.f32 %v767_v46, 0.0  ;;  %2393 = vmatprep.mubr.bf16.mxu1 %v1735_v37  ;;  %v1098_v31 = vmul.f32 %v3071_v7, %v3856_v18  ;;  %v4870_v34 = vld [vmem:[#allocation33_spill] sm:$0xff] }
 0x1f4   : > { %4850 = vst [vmem:[#allocation26_spill] sm:$0xff] %v3861_v29  ;;  %v955_v9 = vsel %vm935_vm1, %v4854_v30, %v4852_v11  ;;  %v3878_v35 = vmul.f32 %v3110_v36, %v3856_v18  ;;  %v878_v27 = vrot.slane %v3858_v10, 7  ;;  %v1675_v44 = vadd.f32 %v3650_v28, %v1636_v13 }
 0x1f5   : > { %v1676_v5 = vadd.f32 %v3650_v28, %v1637_v19  ;;  %v3884_v52 = vsel %vm839_vm0, 0.0, %v881_v49  ;;  %v1096_v45 = vmul.f32 %v3071_v7, %v3858_v10  ;;  %v3902_v57 = vmul.f32 %v3110_v36, %v3858_v10 }
 0x1f6   : > { %4855 = vst [vmem:[#allocation22_spill] sm:$0xff] %v3878_v35  ;;  %4856 = vst [vmem:[#allocation24_spill] sm:$0xff] %v3884_v52  ;;  %v1063_v23 = vmul.f32 %v3073_v8, %v3884_v52  ;;  %v3891_v58 = vmul.f32 %v3113_v38, %v3884_v52  ;;  %v3894_v56 = vsel %vm839_vm0, 0.0, %v878_v27  ;;  %v1707_v33 = vmax.f32 %v1675_v44, 0.0  ;;  %v4873_v35 = vld [vmem:[#allocation35_spill] sm:$0xff] }
 0x1f7   : > { %4858 = vst [vmem:[#allocation47_spill] sm:$0xff] %v3894_v56  ;;  %v1708_v17 = vmax.f32 %v1676_v5, 0.0  ;;  %v1061_v12 = vmul.f32 %v3073_v8, %v3894_v56  ;;  %4859 = vst [vmem:[#allocation21_spill] sm:$0xff] %v3902_v57  ;;  %v3908_v46 = vmul.f32 %v3113_v38, %v3894_v56  ;;  %v882_v16 = vrot.slane %v3861_v29, 7  ;;  %v4889_v56 = vld [vmem:[#allocation36_spill] sm:$0xff] }
 0x1f8   : > { %4857 = vst [vmem:[#allocation39_spill] sm:$0xff] %v3891_v58  ;;  %v3904_v26 = vadd.f32 %v1098_v31, %v1063_v23  ;;  %v1099_v30 = vmul.f32 %v3071_v7, %v3861_v29  ;;  %v879_v13 = vrot.slane %v3871_v6, 7  ;;  %v3922_v31 = vmul.f32 %v3110_v36, %v3861_v29  ;;  %v4874_v58 = vld [vmem:[#allocation40_spill] sm:$0xff] }
 0x1f9   : > { %4861 = vst [vmem:[#allocation32_spill] sm:$0xff] %v3908_v46  ;;  %v1736_v37 = vpack.c.bf16 %v1708_v17, %v1707_v33  ;;  %v3912_v11 = vadd.f32 %v1096_v45, %v1061_v12  ;;  %v3918_v19 = vsel %vm839_vm0, %v881_v49, %v882_v16  ;;  %v1097_v5 = vmul.f32 %v3071_v7, %v3871_v6  ;;  %v4888_v29 = vld [vmem:[#allocation28_spill] sm:$0xff] }
 0x1fa   : > { %4860 = vst [vmem:[#allocation23_spill] sm:$0xff] %v3904_v26  ;;  %4862 = vst [vmem:[#allocation44_spill] sm:$0xff] %v3918_v19  ;;  %v1064_v23 = vmul.f32 %v3073_v8, %v3918_v19  ;;  %v3930_v45 = vsel %vm839_vm0, %v878_v27, %v879_v13  ;;  %v3934_v49 = vmul.f32 %v3110_v36, %v3871_v6  ;;  %v4866_v33 = vrot.slane %v4851_v59, 1 }
 0x1fb   : > { %4863 = vst [vmem:[#allocation68_spill] sm:$0xff] %v3922_v31  ;;  %2394 = vmatmul.mubr.bf16.gmra.mrb[4].mxu1 %v1736_v37  ;;  %4864 = vst [vmem:[#allocation27_spill] sm:$0xff] %v3930_v45  ;;  %v3941_v12 = vmul.f32 %v3113_v38, %v3918_v19  ;;  %v1062_v16 = vmul.f32 %v3073_v8, %v3930_v45  ;;  %v1150_v37 = vmul.f32 %v3084_v14, %v955_v9 }
 0x1fc   : > { %4865 = vst [vmem:[#allocation25_spill] sm:$0xff] %v3934_v49  ;;  %v1021_v17 = vsel %vm935_vm1, %v4866_v33, 0.0  ;;  %v3947_v13 = vadd.f32 %v1099_v30, %v1064_v23  ;;  %v3951_v25 = vmul.f32 %v3113_v38, %v3930_v45  ;;  %v1260_v33 = vadd.f32 %v4870_v34, %v3767_v2  ;;  %v4875_v23 = vld [vmem:[#allocation30_spill] sm:$0xff]  ;;  %v4876_v49 = vld [vmem:[#allocation41_spill] sm:$0xff] }
 0x1fd   : > { %4867 = vst [vmem:[#allocation96_spill] sm:$0xff] %v3941_v12  ;;  %v1151_v27 = vmul.f32 %v3084_v14, %v1021_v17  ;;  %v1261_v44 = vadd.f32 %v4871_v50, %v3784_v22  ;;  %v3957_v31 = vadd.f32 %v1097_v5, %v1062_v16  ;;  %v3960_v12 = vadd.f32 %v1150_v37, %v4873_v35  ;;  %v4877_v2 = vld [vmem:[#allocation29_spill] sm:$0xff]  ;;  %v4878_v22 = vld [vmem:[#allocation34_spill] sm:$0xff] }
 0x1fe   : > { %4868 = vst [vmem:[#allocation97_spill] sm:$0xff] %v3947_v13  ;;  %4869 = vst [vmem:[#allocation98_spill] sm:$0xff] %v3951_v25  ;;  %v1366_v30 = vmul.f32 %v3119_v43, %v955_v9  ;;  %v1328_v52 = vadd.f32 %v4875_v23, %v1260_v33  ;;  %v1367_v13 = vmul.f32 %v3119_v43, %v1021_v17 }
 0x1ff   : > { %4872 = vst [vmem:[#allocation33_spill] sm:$0xff] %v3957_v31  ;;  %v3963_v19 = vadd.f32 %v1151_v27, %v4874_v58  ;;  %v1329_v57 = vadd.f32 %v4876_v49, %v1261_v44  ;;  %v1432_v34 = vmul.f32 %v3124_v47, %v4877_v2  ;;  %v1433_v50 = vmul.f32 %v3124_v47, %v4878_v22  ;;  %v4879_v44 = vld [vmem:[#allocation56_spill] sm:$0xff]  ;;  %v4881_v27 = vld [vmem:[#allocation43_spill] sm:$0xff] }
 0x200   : > { %v1500_v35 = vmul.f32 %v3133_v51, %v4853_v4  ;;  %v1501_v58 = vmul.f32 %v3133_v51, %v4851_v59  ;;  %v1567_v5 = vmul.f32 %v3600_v21, %v955_v9  ;;  %v1396_v16 = vadd.f32 %v3820_v48, %v1328_v52  ;;  %v4884_v59 = vld [vmem:[#allocation31_spill] sm:$0xff]  ;;  %v4885_v48 = vld [vmem:[#allocation38_spill] sm:$0xff] }
 0x201   : > { %v1397_v37 = vadd.f32 %v1365_v15, %v1329_v57  ;;  %v4880_v49 = vrot.slane %v4879_v44, 1  ;;  %v4882_v33 = vrot.slane %v4881_v27, 1  ;;  %v1262_v9 = vadd.f32 %v4884_v59, %v3823_v61 }
 0x202   : > { %v1263_v15 = vadd.f32 %v4885_v48, %v3826_v63  ;;  %v1464_v52 = vadd.f32 %v1432_v34, %v1396_v16  ;;  %v1568_v26 = vmul.f32 %v3600_v21, %v1021_v17  ;;  %v4890_v63 = vld [vmem:[#allocation49_spill] sm:$0xff] }
 0x203   : > { %v958_v23 = vsel %vm935_vm1, %v4882_v33, %v4880_v49  ;;  %v4883_v2 = vmov %v4880_v49  ;;  %v1465_v57 = vadd.f32 %v1433_v50, %v1397_v37  ;;  %v4886_v33 = vld [vmem:[#allocation55_spill] sm:$0xff]  ;;  %v1330_v45 = vadd.f32 %v4888_v29, %v1262_v9 }
 0x204   : > { %v1022_v22 = vsel %vm935_vm1, %v4883_v2, 0.0  ;;  %v1152_v4 = vmul.f32 %v3084_v14, %v958_v23  ;;  %v3995_v49 = vmul.f32 %v3119_v43, %v958_v23  ;;  %v4887_v2 = vld [vmem:[#allocation69_spill] sm:$0xff]  ;;  %v1331_v61 = vadd.f32 %v4889_v56, %v1263_v15  ;;  %v4891_v50 = vld [vmem:[#allocation63_spill] sm:$0xff] }
 0x205   : > { %v1153_v25 = vmul.f32 %v3084_v14, %v1022_v22  ;;  %v1531_v59 = vadd.f32 %v1500_v35, %v1464_v52  ;;  %v1532_v31 = vadd.f32 %v1501_v58, %v1465_v57  ;;  %v1434_v34 = vmul.f32 %v3124_v47, %v4890_v63  ;;  %v2521_v15 = vld [vmem:[%s4652_s2] ss:$0 sm:$0xff] }
 0x206   : > { %v3998_v46 = vadd.f32 %v1152_v4, %v4886_v33  ;;  %v1435_v17 = vmul.f32 %v3124_v47, %v4891_v50  ;;  %v1398_v16 = vadd.f32 %v1366_v30, %v1330_v45  ;;  %v1399_v37 = vadd.f32 %v1367_v13, %v1331_v61  ;;  %v4892_v45 = vld [vmem:[#allocation78_spill] sm:$0xff]  ;;  %v4893_v30 = vld [vmem:[#allocation81_spill] sm:$0xff] }
 0x207   : > { %v4001_v18 = vadd.f32 %v1153_v25, %v4887_v2  ;;  %v1502_v4 = vmul.f32 %v3133_v51, %v4881_v27  ;;  %v1503_v25 = vmul.f32 %v3133_v51, %v4879_v44  ;;  %v1599_v48 = vadd.f32 %v1567_v5, %v1531_v59  ;;  %v4894_v5 = vld [vmem:[#allocation83_spill] sm:$0xff] }
 0x208   : > { %v1600_v29 = vadd.f32 %v1568_v26, %v1532_v31  ;;  %v1569_v56 = vmul.f32 %v3600_v21, %v958_v23  ;;  %v1570_v35 = vmul.f32 %v3600_v21, %v1022_v22  ;;  %v1466_v58 = vadd.f32 %v1434_v34, %v1398_v16  ;;  %v4895_v31 = vld [vmem:[#allocation85_spill] sm:$0xff]  ;;  %v2522_v2 = vld [vmem:[%s4653_s3] ss:$0 sm:$0xff] }
 0x209   : > { %v1467_v9 = vadd.f32 %v1435_v17, %v1399_v37  ;;  %v733_v13 = vmul.f32 %v2521_v15, %v4892_v45  ;;  %v731_v52 = vmul.f32 %v2521_v15, %v4893_v30  ;;  %v1638_v27 = vmul.f32 %v3638_v3, %v1599_v48 }
 0x20a   : > { %v1639_v44 = vmul.f32 %v3638_v3, %v1600_v29  ;;  %v734_v26 = vmul.f32 %v2521_v15, %v4894_v5  ;;  %v732_v23 = vmul.f32 %v2521_v15, %v4895_v31  ;;  %v1533_v57 = vadd.f32 %v1502_v4, %v1466_v58 }
 0x20b   : > { %v1534_v33 = vadd.f32 %v1503_v25, %v1467_v9  ;;  %v772_v61 = vadd.f32 %v2522_v2, %v733_v13  ;;  %v770_v59 = vadd.f32 %v2522_v2, %v731_v52  ;;  %v1677_v63 = vadd.f32 %v3650_v28, %v1638_v27 }
 0x20c   : > { %v1678_v34 = vadd.f32 %v3650_v28, %v1639_v44  ;;  %v773_v50 = vadd.f32 %v2522_v2, %v734_v26  ;;  %v771_v17 = vadd.f32 %v2522_v2, %v732_v23  ;;  %v1601_v16 = vadd.f32 %v1569_v56, %v1533_v57 }
 0x20d   : > { %v1602_v37 = vadd.f32 %v1570_v35, %v1534_v33  ;;  %v4029_v48 = vmax.f32 %v772_v61, 0.0  ;;  %v4031_v29 = vmax.f32 %v770_v59, 0.0  ;;  %v1709_v4 = vmax.f32 %v1677_v63, 0.0  ;;  %v4915_v35 = vld [vmem:[#allocation42_spill] sm:$0xff] }
 0x20e   : > { %v1710_v25 = vmax.f32 %v1678_v34, 0.0  ;;  %v1369_v58 = vmul.f32 %v3119_v43, %v1022_v22  ;;  %v4034_v9 = vmax.f32 %v773_v50, 0.0  ;;  %v1640_v15 = vmul.f32 %v3638_v3, %v1601_v16 }
 0x20f   : > { %4896 = vst [vmem:[#allocation45_spill] sm:$0xff] %v4029_v48  ;;  %v1641_v45 = vmul.f32 %v3638_v3, %v1602_v37  ;;  %v1204_v13 = vrot.slane %v4029_v48, 7  ;;  %v4039_v30 = vmax.f32 %v771_v17, 0.0  ;;  %v4044_v52 = vmul.f32 %v3110_v36, %v4029_v48 }
 0x210   : > { %4897 = vst [vmem:[#allocation35_spill] sm:$0xff] %v4034_v9  ;;  %v1737_v56 = vpack.c.bf16 %v1710_v25, %v1709_v4  ;;  %v884_v27 = vrot.slane %v4031_v29, 7  ;;  %v1679_v22 = vadd.f32 %v3650_v28, %v1640_v15  ;;  %v4052_v26 = vmul.f32 %v3133_v51, %v4029_v48 }
 0x211   : > { %4898 = vst [vmem:[#allocation40_spill] sm:$0xff] %v4044_v52  ;;  %v1680_v44 = vadd.f32 %v3650_v28, %v1641_v45  ;;  %v1209_v5 = vsel %vm839_vm0, 0.0, %v1204_v13  ;;  %v1100_v63 = vmul.f32 %v3071_v7, %v4031_v29  ;;  %v4074_v50 = vmul.f32 %v3110_v36, %v4031_v29 }
 0x212   : > { %4899 = vst [vmem:[#allocation30_spill] sm:$0xff] %v4052_v26  ;;  %2397 = vmatprep.mubr.bf16.mxu1 %v1737_v56  ;;  %v4055_v31 = vmul.f32 %v3113_v38, %v1209_v5  ;;  %v4058_v23 = vmul.f32 %v3124_v47, %v1209_v5  ;;  %v4061_v57 = vsel %vm839_vm0, 0.0, %v884_v27  ;;  %v1711_v2 = vmax.f32 %v1679_v22, 0.0 }
 0x213   : > { %4902 = vst [vmem:[#allocation34_spill] sm:$0xff] %v4061_v57  ;;  %v1712_v61 = vmax.f32 %v1680_v44, 0.0  ;;  %v1065_v59 = vmul.f32 %v3073_v8, %v4061_v57  ;;  %v4070_v34 = vmul.f32 %v3113_v38, %v4061_v57  ;;  %4904 = vst [vmem:[#allocation43_spill] sm:$0xff] %v4074_v50  ;;  %v1205_v17 = vrot.slane %v4034_v9, 7 }
 0x214   : > { %4900 = vst [vmem:[#allocation41_spill] sm:$0xff] %v4055_v31  ;;  %4901 = vst [vmem:[#allocation29_spill] sm:$0xff] %v4058_v23  ;;  %v4719_v16 = vrot.slane %v4034_v9, 1  ;;  %v4082_v25 = vmul.f32 %v3110_v36, %v4034_v9  ;;  %v885_v15 = vrot.slane %v4039_v30, 7  ;;  %v4095_v22 = vmul.f32 %v3133_v51, %v4034_v9  ;;  %v4922_v23 = vld [vmem:[#allocation62_spill] sm:$0xff] }
 0x215   : > { %4903 = vst [vmem:[#allocation56_spill] sm:$0xff] %v4070_v34  ;;  %v1738_v37 = vpack.c.bf16 %v1712_v61, %v1711_v2  ;;  %v4078_v4 = vadd.f32 %v1100_v63, %v1065_v59  ;;  %v4086_v45 = vsel %vm839_vm0, %v1204_v13, %v1205_v17  ;;  %v1101_v61 = vmul.f32 %v3071_v7, %v4039_v30  ;;  %v4913_v17 = vld [vmem:[#allocation51_spill] sm:$0xff] }
 0x216   : > { %4905 = vst [vmem:[#allocation31_spill] sm:$0xff] %v4082_v25  ;;  %4906 = vst [vmem:[#allocation38_spill] sm:$0xff] %v4086_v45  ;;  %v4091_v56 = vsel %vm935_vm1, %v4719_v16, 0.0  ;;  %v4100_v5 = vmul.f32 %v3113_v38, %v4086_v45  ;;  %v4107_v2 = vsel %vm839_vm0, %v884_v27, %v885_v15  ;;  %v4115_v63 = vmul.f32 %v3110_v36, %v4039_v30  ;;  %v4919_v36 = vld [vmem:[#allocation67_spill] sm:$0xff]  ;;  %v4925_v45 = vld [vmem:[#allocation48_spill] sm:$0xff] }
 0x217   : > { %4907 = vst [vmem:[#allocation55_spill] sm:$0xff] %v4091_v56  ;;  %4908 = vst [vmem:[#allocation69_spill] sm:$0xff] %v4095_v22  ;;  %2398 = vmatmul.mubr.bf16.gmra.mrb[8].mxu1 %v1738_v37  ;;  %v4104_v13 = vmul.f32 %v3119_v43, %v4091_v56  ;;  %v1066_v59 = vmul.f32 %v3073_v8, %v4107_v2  ;;  %v4914_v37 = vrot.slane %v4913_v17, 1  ;;  %v4916_v16 = vrot.slane %v4915_v35, 1  ;;  %v4918_v8 = vld [vmem:[#allocation54_spill] sm:$0xff] }
 0x218   : > { %4909 = vst [vmem:[#allocation28_spill] sm:$0xff] %v4100_v5  ;;  %4911 = vst [vmem:[#allocation49_spill] sm:$0xff] %v4107_v2  ;;  %v1265_v56 = vadd.f32 %v4919_v36, %v3963_v19  ;;  %v4135_v26 = vmul.f32 %v3113_v38, %v4107_v2  ;;  %v4923_v5 = vld [vmem:[#allocation50_spill] sm:$0xff]  ;;  %v1436_v19 = vmul.f32 %v3124_v47, %v4925_v45 }
 0x219   : > { %4910 = vst [vmem:[#allocation36_spill] sm:$0xff] %v4104_v13  ;;  %4912 = vst [vmem:[#allocation63_spill] sm:$0xff] %v4115_v63  ;;  %v961_v33 = vsel %vm935_vm1, %v4916_v16, %v4914_v37  ;;  %v4917_v44 = vmov %v4914_v37  ;;  %v1264_v13 = vadd.f32 %v4918_v8, %v3960_v12  ;;  %v4131_v22 = vadd.f32 %v1101_v61, %v1066_v59  ;;  %v4921_v37 = vld [vmem:[#allocation53_spill] sm:$0xff]  ;;  %v4926_v61 = vld [vmem:[#allocation58_spill] sm:$0xff] }
 0x21a   : > { %v1023_v27 = vsel %vm935_vm1, %v4917_v44, 0.0  ;;  %v1154_v15 = vmul.f32 %v3084_v14, %v961_v33  ;;  %4920 = vst [vmem:[#allocation78_spill] sm:$0xff] %v4135_v26  ;;  %v1370_v16 = vmul.f32 %v3119_v43, %v961_v33  ;;  %v4924_v12 = vld [vmem:[#allocation61_spill] sm:$0xff]  ;;  %v1437_v59 = vmul.f32 %v3124_v47, %v4926_v61  ;;  %v4932_v63 = vld [vmem:[#allocation52_spill] sm:$0xff]  ;;  %v4934_v26 = vld [vmem:[#allocation79_spill] sm:$0xff] }
 0x21b   : > { %v1155_v7 = vmul.f32 %v3084_v14, %v1023_v27  ;;  %v1371_v44 = vmul.f32 %v3119_v43, %v1023_v27  ;;  %v1332_v31 = vadd.f32 %v4923_v5, %v1264_v13  ;;  %v1333_v8 = vadd.f32 %v4924_v12, %v1265_v56  ;;  %v4927_v5 = vld [vmem:[#allocation73_spill] sm:$0xff]  ;;  %v4929_v56 = vld [vmem:[#allocation66_spill] sm:$0xff] }
 0x21c   : > { %v1186_v25 = vadd.f32 %v1154_v15, %v4921_v37  ;;  %v1504_v38 = vmul.f32 %v3133_v51, %v4915_v35  ;;  %v1505_v36 = vmul.f32 %v3133_v51, %v4913_v17  ;;  %v4928_v13 = vrot.slane %v4927_v5, 1 }
 0x21d   : > { %v1187_v52 = vadd.f32 %v1155_v7, %v4922_v23  ;;  %v1400_v15 = vadd.f32 %v3995_v49, %v1332_v31  ;;  %v1401_v37 = vadd.f32 %v1369_v58, %v1333_v8  ;;  %v1571_v23 = vmul.f32 %v3600_v21, %v961_v33  ;;  %v4933_v49 = vld [vmem:[#allocation60_spill] sm:$0xff] }
 0x21e   : > { %v4930_v7 = vrot.slane %v4929_v56, 1  ;;  %v4931_v12 = vmov %v4928_v13  ;;  %v1266_v17 = vadd.f32 %v4932_v63, %v3998_v46  ;;  %v1267_v58 = vadd.f32 %v4933_v49, %v4001_v18  ;;  %v4937_v63 = vld [vmem:[#allocation87_spill] sm:$0xff]  ;;  %v4938_v18 = vld [vmem:[#allocation74_spill] sm:$0xff] }
 0x21f   : > { %v1024_v61 = vsel %vm935_vm1, %v4931_v12, 0.0  ;;  %v1468_v31 = vadd.f32 %v1436_v19, %v1400_v15  ;;  %v1469_v33 = vadd.f32 %v1437_v59, %v1401_v37  ;;  %v1572_v8 = vmul.f32 %v3600_v21, %v1023_v27  ;;  %v4936_v12 = vld [vmem:[#allocation59_spill] sm:$0xff] }
 0x220   : > { %v964_v45 = vsel %vm935_vm1, %v4930_v7, %v4928_v13  ;;  %v1157_v50 = vmul.f32 %v3084_v14, %v1024_v61  ;;  %v4935_v7 = vld [vmem:[#allocation46_spill] sm:$0xff]  ;;  %v1335_v48 = vadd.f32 %v4936_v12, %v1267_v58  ;;  %v1438_v19 = vmul.f32 %v3124_v47, %v4938_v18  ;;  %v4939_v58 = vld [vmem:[#allocation72_spill] sm:$0xff] }
 0x221   : > { %v1156_v35 = vmul.f32 %v3084_v14, %v964_v45  ;;  %v1334_v34 = vadd.f32 %v4935_v7, %v1266_v17  ;;  %v1372_v9 = vmul.f32 %v3119_v43, %v964_v45  ;;  %v1535_v2 = vadd.f32 %v1504_v38, %v1468_v31 }
 0x222   : > { %v1536_v46 = vadd.f32 %v1505_v36, %v1469_v33  ;;  %v1189_v57 = vadd.f32 %v1157_v50, %v4937_v63  ;;  %v1403_v27 = vadd.f32 %v1371_v44, %v1335_v48  ;;  %v1439_v15 = vmul.f32 %v3124_v47, %v3556_v60  ;;  %v4941_v48 = vld [vmem:[#allocation57_spill] sm:$0xff]  ;;  %v4945_v63 = vld [vmem:[#allocation71_spill] sm:$0xff] }
 0x223   : > { %v4169_v13 = vadd.f32 %v1156_v35, %v4934_v26  ;;  %v1402_v59 = vadd.f32 %v1370_v16, %v1334_v34  ;;  %v1506_v26 = vmul.f32 %v3133_v51, %v4929_v56  ;;  %v1603_v37 = vadd.f32 %v1571_v23, %v1535_v2 }
 0x224   : > { %v1604_v35 = vadd.f32 %v1572_v8, %v1536_v46  ;;  %v1507_v17 = vmul.f32 %v3133_v51, %v4927_v5  ;;  %v1573_v38 = vmul.f32 %v3600_v21, %v964_v45  ;;  %v1471_v50 = vadd.f32 %v1439_v15, %v1403_v27  ;;  %v4944_v8 = vld [vmem:[#allocation76_spill] sm:$0xff]  ;;  %v4946_v15 = vld [vmem:[#allocation86_spill] sm:$0xff] }
 0x225   : > { %v1470_v36 = vadd.f32 %v1438_v19, %v1402_v59  ;;  %v1574_v49 = vmul.f32 %v3600_v21, %v1024_v61  ;;  %v4940_v34 = vrot.slane %v4939_v58, 1  ;;  %v4942_v16 = vrot.slane %v4941_v48, 1 }
 0x226   : > { %v1642_v44 = vmul.f32 %v3638_v3, %v1603_v37  ;;  %v1643_v2 = vmul.f32 %v3638_v3, %v1604_v35  ;;  %v1538_v31 = vadd.f32 %v1507_v17, %v1471_v50  ;;  %v1268_v7 = vadd.f32 %v4944_v8, %v1186_v25  ;;  %v4948_v50 = vld [vmem:[#allocation82_spill] sm:$0xff] }
 0x227   : > { %v967_v60 = vsel %vm935_vm1, %v4942_v16, %v4940_v34  ;;  %v4943_v23 = vmov %v4940_v34  ;;  %v1537_v45 = vadd.f32 %v1506_v26, %v1470_v36  ;;  %v1269_v19 = vadd.f32 %v3617_v42, %v1187_v52  ;;  %v4947_v26 = vld [vmem:[#allocation75_spill] sm:$0xff] }
 0x228   : > { %v1025_v5 = vsel %vm935_vm1, %v4943_v23, 0.0  ;;  %v1158_v56 = vmul.f32 %v3084_v14, %v967_v60  ;;  %v1681_v12 = vadd.f32 %v3650_v28, %v1642_v44  ;;  %v1682_v46 = vadd.f32 %v3650_v28, %v1643_v2 }
 0x229   : > { %v1159_v33 = vmul.f32 %v3084_v14, %v1025_v5  ;;  %v1605_v59 = vadd.f32 %v1573_v38, %v1537_v45  ;;  %v1606_v27 = vadd.f32 %v1574_v49, %v1538_v31  ;;  %v1336_v35 = vadd.f32 %v4947_v26, %v1268_v7  ;;  %v4949_v49 = vld [vmem:[#allocation64_spill] sm:$0xff] }
 0x22a   : > { %v4201_v18 = vadd.f32 %v1158_v56, %v4945_v63  ;;  %v1713_v17 = vmax.f32 %v1681_v12, 0.0  ;;  %v1714_v36 = vmax.f32 %v1682_v46, 0.0  ;;  %v1373_v25 = vmul.f32 %v3119_v43, %v1024_v61  ;;  %v4950_v56 = vld [vmem:[#allocation80_spill] sm:$0xff] }
 0x22b   : > { %v4205_v37 = vadd.f32 %v1159_v33, %v4946_v15  ;;  %v1337_v34 = vadd.f32 %v4948_v50, %v1269_v19  ;;  %v1644_v16 = vmul.f32 %v3638_v3, %v1605_v59  ;;  %v1645_v44 = vmul.f32 %v3638_v3, %v1606_v27  ;;  %v4954_v50 = vld [vmem:[#allocation70_spill] sm:$0xff] }
 0x22c   : > { %v1374_v2 = vmul.f32 %v3119_v43, %v967_v60  ;;  %v1404_v42 = vadd.f32 %v1372_v9, %v1336_v35  ;;  %v1739_v52 = vpack.c.bf16 %v1714_v36, %v1713_v17  ;;  %v1440_v23 = vmul.f32 %v3124_v47, %v4949_v49 }
 0x22d   : > { %v1405_v38 = vadd.f32 %v1373_v25, %v1337_v34  ;;  %v1441_v45 = vmul.f32 %v3124_v47, %v4950_v56  ;;  %v1683_v31 = vadd.f32 %v3650_v28, %v1644_v16  ;;  %v1684_v61 = vadd.f32 %v3650_v28, %v1645_v44  ;;  %v4955_v16 = vld [vmem:[#allocation84_spill] sm:$0xff] }
 0x22e   : > { %v1508_v33 = vmul.f32 %v3133_v51, %v4941_v48  ;;  %v1509_v8 = vmul.f32 %v3133_v51, %v4939_v58  ;;  %2401 = vmatprep.mubr.bf16.mxu1 %v1739_v52  ;;  %v1472_v9 = vadd.f32 %v1440_v23, %v1404_v42  ;;  %v1575_v12 = vmul.f32 %v3600_v21, %v967_v60  ;;  %v4956_v23 = vld [vmem:[#allocation65_spill] sm:$0xff] }
 0x22f   : > { %v1473_v7 = vadd.f32 %v1441_v45, %v1405_v38  ;;  %v1576_v46 = vmul.f32 %v3600_v21, %v1025_v5  ;;  %v1715_v63 = vmax.f32 %v1683_v31, 0.0  ;;  %v1716_v19 = vmax.f32 %v1684_v61, 0.0  ;;  %v4957_v45 = vld [vmem:[#allocation77_spill] sm:$0xff] }
 0x230   : > { %v4951_v59 = vrot.slane %v3743_v1, 1  ;;  %v4952_v27 = vrot.slane %v3686_v53, 1  ;;  %v1539_v58 = vadd.f32 %v1508_v33, %v1472_v9  ;;  %v1375_v25 = vmul.f32 %v3119_v43, %v1025_v5 }
 0x231   : > { %v1540_v35 = vadd.f32 %v1509_v8, %v1473_v7  ;;  %v1740_v36 = vpack.c.bf16 %v1716_v19, %v1715_v63  ;;  %v1270_v34 = vadd.f32 %v4954_v50, %v4169_v13  ;;  %v1271_v44 = vadd.f32 %v4955_v16, %v1189_v57 }
 0x232   : > { %v970_v15 = vsel %vm935_vm1, %v4952_v27, %v4951_v59  ;;  %v4953_v48 = vmov %v4951_v59  ;;  %v1607_v42 = vadd.f32 %v1575_v12, %v1539_v58  ;;  %v1442_v5 = vmul.f32 %v3124_v47, %v3714_v32 }
 0x233   : > { %v1026_v26 = vsel %vm935_vm1, %v4953_v48, 0.0  ;;  %v1160_v17 = vmul.f32 %v3084_v14, %v970_v15  ;;  %v1608_v52 = vadd.f32 %v1576_v46, %v1540_v35  ;;  %2402 = vmatmul.mubr.bf16.gmra.mrb[12].mxu1 %v1740_v36  ;;  %v1338_v56 = vadd.f32 %v4956_v23, %v1270_v34 }
 0x234   : > { %v1161_v60 = vmul.f32 %v3084_v14, %v1026_v26  ;;  %v1339_v31 = vadd.f32 %v4957_v45, %v1271_v44  ;;  %v1376_v61 = vmul.f32 %v3119_v43, %v970_v15  ;;  %v1646_v13 = vmul.f32 %v3638_v3, %v1607_v42  ;;  %v4961_v44 = vld [vmem:[#allocation91_spill] sm:$0xff]  ;;  %v4963_v45 = vld [vmem:[#allocation88_spill] sm:$0xff] }
 0x235   : > { %v1192_v38 = vadd.f32 %v1160_v17, %v3736_v54  ;;  %v1647_v57 = vmul.f32 %v3638_v3, %v1608_v52  ;;  %v1443_v33 = vmul.f32 %v3124_v47, %v3772_v41  ;;  %v1510_v54 = vmul.f32 %v3133_v51, %v3686_v53 }
 0x236   : > { %v1193_v49 = vadd.f32 %v1161_v60, %v3797_v62  ;;  %v1406_v62 = vadd.f32 %v1374_v2, %v1338_v56  ;;  %v1407_v8 = vadd.f32 %v1375_v25, %v1339_v31  ;;  %v1511_v9 = vmul.f32 %v3133_v51, %v3743_v1  ;;  %v4962_v56 = vld [vmem:[#allocation95_spill] sm:$0xff] }
 0x237   : > { %v1577_v7 = vmul.f32 %v3600_v21, %v970_v15  ;;  %v1685_v12 = vadd.f32 %v3650_v28, %v1646_v13  ;;  %v1686_v32 = vadd.f32 %v3650_v28, %v1647_v57  ;;  %v1578_v46 = vmul.f32 %v3600_v21, %v1026_v26 }
 0x238   : > { %v4958_v63 = vrot.slane %v3696_v55, 1  ;;  %v4959_v41 = vrot.slane %v3683_v0, 1  ;;  %v1474_v53 = vadd.f32 %v1442_v5, %v1406_v62  ;;  %v1475_v2 = vadd.f32 %v1443_v33, %v1407_v8 }
 0x239   : > { %v1717_v15 = vmax.f32 %v1685_v12, 0.0  ;;  %v1718_v48 = vmax.f32 %v1686_v32, 0.0  ;;  %v1272_v35 = vadd.f32 %v3726_v39, %v4201_v18  ;;  %v1273_v25 = vadd.f32 %v3790_v20, %v4205_v37  ;;  %v4964_v20 = vld [vmem:[#allocation92_spill] sm:$0xff] }
 0x23a   : > { %v973_v19 = vsel %vm935_vm1, %v4959_v41, %v4958_v63  ;;  %v4960_v59 = vmov %v4958_v63  ;;  %v1541_v17 = vadd.f32 %v1510_v54, %v1474_v53  ;;  %v1542_v60 = vadd.f32 %v1511_v9, %v1475_v2 }
 0x23b   : > { %v1027_v1 = vsel %vm935_vm1, %v4960_v59, 0.0  ;;  %v1162_v27 = vmul.f32 %v3084_v14, %v973_v19  ;;  %v1741_v50 = vpack.c.bf16 %v1718_v48, %v1717_v15  ;;  %v1377_v34 = vmul.f32 %v3119_v43, %v1026_v26  ;;  %v4969_v15 = vld [vmem:[#allocation94_spill] sm:$0xff] }
 0x23c   : > { %v1163_v58 = vmul.f32 %v3084_v14, %v1027_v1  ;;  %v1340_v42 = vadd.f32 %v4961_v44, %v1272_v35  ;;  %v1609_v52 = vadd.f32 %v1577_v7, %v1541_v17  ;;  %v1610_v23 = vadd.f32 %v1578_v46, %v1542_v60  ;;  %v4970_v17 = vld [vmem:[#allocation33_spill] sm:$0xff] }
 0x23d   : > { %v4271_v36 = vadd.f32 %v1162_v27, %v3729_v40  ;;  %v1341_v39 = vadd.f32 %v4962_v56, %v1273_v25  ;;  %v1378_v18 = vmul.f32 %v3119_v43, %v973_v19  ;;  %2405 = vmatprep.mubr.bf16.mxu1 %v1741_v50  ;;  %v1444_v31 = vmul.f32 %v3124_v47, %v4963_v45  ;;  %v4971_v25 = vld [vmem:[#allocation89_spill] sm:$0xff] }
 0x23e   : > { %v4277_v16 = vadd.f32 %v1163_v58, %v3763_v24  ;;  %v1408_v40 = vadd.f32 %v1376_v61, %v1340_v42  ;;  %v1445_v37 = vmul.f32 %v3124_v47, %v4964_v20  ;;  %v1512_v24 = vmul.f32 %v3133_v51, %v3683_v0 }
 0x23f   : > { %v1648_v26 = vmul.f32 %v3638_v3, %v1609_v52  ;;  %v1649_v5 = vmul.f32 %v3638_v3, %v1610_v23  ;;  %v1409_v13 = vadd.f32 %v1377_v34, %v1341_v39  ;;  %v1513_v57 = vmul.f32 %v3133_v51, %v3696_v55  ;;  %v4972_v52 = vld [vmem:[#allocation93_spill] sm:$0xff]  ;;  %v4973_v39 = vld [vmem:[#allocation47_spill] sm:$0xff] }
 0x240   : > { %v1476_v33 = vadd.f32 %v1444_v31, %v1408_v40  ;;  %v1579_v61 = vmul.f32 %v3600_v21, %v973_v19  ;;  %v1580_v54 = vmul.f32 %v3600_v21, %v1027_v1  ;;  %v4965_v62 = vrot.slane %v3871_v6, 1  ;;  %v4968_v19 = vld [vmem:[#allocation90_spill] sm:$0xff]  ;;  %v4974_v31 = vld [vmem:[#allocation27_spill] sm:$0xff] }
 0x241   : > { %v4966_v8 = vrot.slane %v3858_v10, 1  ;;  %v1687_v0 = vadd.f32 %v3650_v28, %v1648_v26  ;;  %v1688_v7 = vadd.f32 %v3650_v28, %v1649_v5  ;;  %v1477_v12 = vadd.f32 %v1445_v37, %v1409_v13 }
 0x242   : > { %v4967_v32 = vmov %v4965_v62  ;;  %v1543_v46 = vadd.f32 %v1512_v24, %v1476_v33  ;;  %v1274_v53 = vadd.f32 %v4968_v19, %v1192_v38  ;;  %v1275_v48 = vadd.f32 %v4969_v15, %v1193_v49  ;;  %v4975_v33 = vld [vmem:[#allocation26_spill] sm:$0xff] }
 0x243   : > { %v976_v9 = vsel %vm935_vm1, %v4966_v8, %v4965_v62  ;;  %v1028_v55 = vsel %vm935_vm1, %v4967_v32, 0.0  ;;  %v1719_v2 = vmax.f32 %v1687_v0, 0.0  ;;  %v1720_v59 = vmax.f32 %v1688_v7, 0.0 }
 0x244   : > { %v1164_v63 = vmul.f32 %v3084_v14, %v976_v9  ;;  %v1165_v41 = vmul.f32 %v3084_v14, %v1028_v55  ;;  %v1544_v27 = vadd.f32 %v1513_v57, %v1477_v12  ;;  %v1611_v58 = vadd.f32 %v1579_v61, %v1543_v46 }
 0x245   : > { %v1342_v50 = vadd.f32 %v4971_v25, %v1274_v53  ;;  %v1742_v34 = vpack.c.bf16 %v1720_v59, %v1719_v2  ;;  %v1379_v44 = vmul.f32 %v3119_v43, %v1027_v1  ;;  %v1343_v38 = vadd.f32 %v4972_v52, %v1275_v48  ;;  %v4981_v53 = vld [vmem:[#allocation23_spill] sm:$0xff]  ;;  %v4982_v59 = vld [vmem:[#allocation98_spill] sm:$0xff]  ;;  %v4984_v25 = vld [vmem:[#allocation21_spill] sm:$0xff] }
 0x246   : > { %v4309_v35 = vadd.f32 %v1164_v63, %v3912_v11  ;;  %v4312_v60 = vadd.f32 %v1165_v41, %v4970_v17  ;;  %v1612_v42 = vadd.f32 %v1580_v54, %v1544_v27  ;;  %v1650_v23 = vmul.f32 %v3638_v3, %v1611_v58  ;;  %v4977_v54 = vld [vmem:[#allocation37_spill] sm:$0xff] }
 0x247   : > { %v1380_v56 = vmul.f32 %v3119_v43, %v976_v9  ;;  %v1410_v49 = vadd.f32 %v1378_v18, %v1342_v50  ;;  %v1446_v11 = vmul.f32 %v3124_v47, %v4973_v39  ;;  %2406 = vmatmul.mubr.bf16.gmra.mrb[16].mxu1 %v1742_v34  ;;  %v1411_v45 = vadd.f32 %v1379_v44, %v1343_v38  ;;  %v4983_v58 = vld [vmem:[#allocation97_spill] sm:$0xff] }
 0x248   : > { %v1651_v40 = vmul.f32 %v3638_v3, %v1612_v42  ;;  %v1447_v20 = vmul.f32 %v3124_v47, %v4974_v31  ;;  %v1514_v1 = vmul.f32 %v3133_v51, %v3858_v10  ;;  %v1689_v37 = vadd.f32 %v3650_v28, %v1650_v23  ;;  %v4985_v44 = vld [vmem:[#allocation25_spill] sm:$0xff]  ;;  %v4986_v23 = vld [vmem:[#allocation24_spill] sm:$0xff] }
 0x249   : > { %v1478_v24 = vadd.f32 %v1446_v11, %v1410_v49  ;;  %v1515_v26 = vmul.f32 %v3133_v51, %v3871_v6  ;;  %v1581_v18 = vmul.f32 %v3600_v21, %v976_v9  ;;  %v1582_v57 = vmul.f32 %v3600_v21, %v1028_v55  ;;  %v4980_v21 = vld [vmem:[#allocation32_spill] sm:$0xff] }
 0x24a   : > { %v1690_v5 = vadd.f32 %v3650_v28, %v1651_v40  ;;  %v1479_v13 = vadd.f32 %v1447_v20, %v1411_v45  ;;  %v4976_v61 = vrot.slane %v4975_v33, 1  ;;  %v4978_v62 = vrot.slane %v4977_v54, 1  ;;  %v4987_v49 = vld [vmem:[#allocation44_spill] sm:$0xff] }
 0x24b   : > { %v1721_v10 = vmax.f32 %v1689_v37, 0.0  ;;  %v1545_v0 = vadd.f32 %v1514_v1, %v1478_v24  ;;  %v1276_v63 = vadd.f32 %v4980_v21, %v4271_v36  ;;  %v1381_v41 = vmul.f32 %v3119_v43, %v1028_v55 }
 0x24c   : > { %v979_v8 = vsel %vm935_vm1, %v4978_v62, %v4976_v61  ;;  %v4979_v7 = vmov %v4976_v61  ;;  %v1722_v9 = vmax.f32 %v1690_v5, 0.0  ;;  %v1546_v32 = vadd.f32 %v1515_v26, %v1479_v13  ;;  %v4991_v62 = vld [vmem:[#allocation39_spill] sm:$0xff] }
 0x24d   : > { %v1029_v12 = vsel %vm935_vm1, %v4979_v7, 0.0  ;;  %v1166_v6 = vmul.f32 %v3084_v14, %v979_v8  ;;  %v1613_v19 = vadd.f32 %v1581_v18, %v1545_v0  ;;  %v1277_v27 = vadd.f32 %v4982_v59, %v4277_v16 }
 0x24e   : > { %v1167_v46 = vmul.f32 %v3084_v14, %v1029_v12  ;;  %v1743_v15 = vpack.c.bf16 %v1722_v9, %v1721_v10  ;;  %v1614_v48 = vadd.f32 %v1582_v57, %v1546_v32  ;;  %v1344_v50 = vadd.f32 %v4984_v25, %v1276_v63  ;;  %v4993_v63 = vld [vmem:[#allocation22_spill] sm:$0xff] }
 0x24f   : > { %v1198_v2 = vadd.f32 %v1166_v6, %v4981_v53  ;;  %v1652_v34 = vmul.f32 %v3638_v3, %v1613_v19  ;;  %v1345_v42 = vadd.f32 %v4985_v44, %v1277_v27  ;;  %v1382_v36 = vmul.f32 %v3119_v43, %v979_v8  ;;  %v4992_v6 = vld [vmem:[#allocation96_spill] sm:$0xff]  ;;  %v4995_v27 = vld [vmem:[#allocation34_spill] sm:$0xff]  ;;  %v4407_v44 = vld [vmem:[%s4656_s6] ss:$0 sm:$0xff] }
 0x250   : > { %v1199_v17 = vadd.f32 %v1167_v46, %v4983_v58  ;;  %v1383_v55 = vmul.f32 %v3119_v43, %v1029_v12  ;;  %2409 = vmatprep.mubr.bf16.mxu1 %v1743_v15  ;;  %v1653_v52 = vmul.f32 %v3638_v3, %v1614_v48  ;;  %v1412_v38 = vadd.f32 %v1380_v56, %v1344_v50  ;;  %v4365_v3 = vld [vmem:[#allocation7 + $0x8] ss:$0 sm:$0xff]  ;;  %v4996_v15 = vld [vmem:[#allocation49_spill] sm:$0xff] }
 0x251   : > { %v1448_v16 = vmul.f32 %v3124_v47, %v4986_v23  ;;  %v1449_v39 = vmul.f32 %v3124_v47, %v4987_v49  ;;  %v1691_v11 = vadd.f32 %v3650_v28, %v1652_v34  ;;  %v1413_v40 = vadd.f32 %v1381_v41, %v1345_v42  ;;  %v4994_v53 = vld [vmem:[#allocation68_spill] sm:$0xff] }
 0x252   : > { %v1516_v45 = vmul.f32 %v3133_v51, %v4977_v54  ;;  %v1517_v31 = vmul.f32 %v3133_v51, %v4975_v33  ;;  %v1692_v20 = vadd.f32 %v3650_v28, %v1653_v52  ;;  %v1583_v56 = vmul.f32 %v4365_v3, %v979_v8 }
 0x253   : > { %v1480_v1 = vadd.f32 %v1448_v16, %v1412_v38  ;;  %v4988_v37 = vrot.slane %v4039_v30, 1  ;;  %v4989_v24 = vrot.slane %v4031_v29, 1  ;;  %v1723_v18 = vmax.f32 %v1691_v11, 0.0  ;;  %v4997_v38 = vld [vmem:[#allocation35_spill] sm:$0xff]  ;;  %v4999_v16 = vld [vmem:[#allocation45_spill] sm:$0xff] }
 0x254   : > { %v1481_v5 = vadd.f32 %v1449_v39, %v1413_v40  ;;  %v1724_v28 = vmax.f32 %v1692_v20, 0.0  ;;  %v1278_v8 = vadd.f32 %v4991_v62, %v4309_v35  ;;  %v1584_v0 = vmul.f32 %v4365_v3, %v1029_v12  ;;  %v5002_v40 = vld [vmem:[#allocation78_spill] sm:$0xff] }
 0x255   : > { %v982_v26 = vsel %vm935_vm1, %v4989_v24, %v4988_v37  ;;  %v4990_v13 = vmov %v4988_v37  ;;  %v1547_v61 = vadd.f32 %v1516_v45, %v1480_v1  ;;  %v1279_v9 = vadd.f32 %v4992_v6, %v4312_v60 }
 0x256   : > { %v1030_v57 = vsel %vm935_vm1, %v4990_v13, 0.0  ;;  %v1168_v33 = vmul.f32 %v3084_v14, %v982_v26  ;;  %v1548_v10 = vadd.f32 %v1517_v31, %v1481_v5  ;;  %v1744_v32 = vpack.c.bf16 %v1724_v28, %v1723_v18  ;;  %v5004_v5 = vld [vmem:[#allocation63_spill] sm:$0xff]  ;;  %v5005_v28 = vld [vmem:[#allocation38_spill] sm:$0xff] }
 0x257   : > { %v1169_v54 = vmul.f32 %v3084_v14, %v1030_v57  ;;  %v1615_v46 = vadd.f32 %v1583_v56, %v1547_v61  ;;  %v1346_v41 = vadd.f32 %v4993_v63, %v1278_v8  ;;  %v1347_v14 = vadd.f32 %v4994_v53, %v1279_v9  ;;  %v5008_v9 = vld [vmem:[#allocation40_spill] sm:$0xff] }
 0x258   : > { %v1200_v7 = vadd.f32 %v1168_v33, %v4078_v4  ;;  %v1616_v19 = vadd.f32 %v1584_v0, %v1548_v10  ;;  %v1384_v59 = vmul.f32 %v3119_v43, %v982_v26  ;;  %v1385_v35 = vmul.f32 %v3119_v43, %v1030_v57  ;;  %2410 = vmatmul.mubr.bf16.gmra.mrb[20].mxu1 %v1744_v32  ;;  %v4392_v4 = vld [vmem:[%s4655_s5] ss:$0 sm:$0xff]  ;;  %v5007_v0 = vld [vmem:[#allocation28_spill] sm:$0xff] }
 0x259   : > { %v1201_v21 = vadd.f32 %v1169_v54, %v4131_v22  ;;  %v1654_v60 = vmul.f32 %v4392_v4, %v1615_v46  ;;  %v1414_v12 = vadd.f32 %v1382_v36, %v1346_v41  ;;  %v1450_v22 = vmul.f32 %v3124_v47, %v4995_v27  ;;  %v5006_v54 = vld [vmem:[#allocation41_spill] sm:$0xff]  ;;  %v5009_v46 = vld [vmem:[#allocation18_spill] sm:$0xff] }
 0x25a   : > { %v1451_v48 = vmul.f32 %v3124_v47, %v4996_v15  ;;  %v1655_v58 = vmul.f32 %v4392_v4, %v1616_v19  ;;  %v1415_v25 = vadd.f32 %v1383_v55, %v1347_v14  ;;  %v1518_v50 = vmul.f32 %v3133_v51, %v4031_v29  ;;  %v5010_v19 = vld [vmem:[#allocation29_spill] sm:$0xff]  ;;  %v5013_v15 = vld [vmem:[#allocation30_spill] sm:$0xff] }
 0x25b   : > { %v1519_v34 = vmul.f32 %v3133_v51, %v4039_v30  ;;  %v1693_v42 = vadd.f32 %v4407_v44, %v1654_v60  ;;  %v1482_v36 = vadd.f32 %v1450_v22, %v1414_v12  ;;  %v1585_v52 = vmul.f32 %v4365_v3, %v982_v26  ;;  %v5001_v30 = vld [vmem:[#allocation56_spill] sm:$0xff]  ;;  %v5003_v26 = vld [vmem:[#allocation43_spill] sm:$0xff] }
 0x25c   : > { %v4998_v23 = vrot.slane %v4997_v38, 1  ;;  %v5000_v55 = vrot.slane %v4999_v16, 1  ;;  %v1694_v29 = vadd.f32 %v4407_v44, %v1655_v58  ;;  %v1483_v39 = vadd.f32 %v1451_v48, %v1415_v25  ;;  %v5014_v58 = vld [vmem:[#allocation69_spill] sm:$0xff] }
 0x25d   : > { %v1280_v11 = vadd.f32 %v5001_v30, %v1198_v2  ;;  %v1281_v45 = vadd.f32 %v5002_v40, %v1199_v17  ;;  %v1725_v31 = vmax.f32 %v1693_v42, 0.0  ;;  %v1549_v20 = vadd.f32 %v1518_v50, %v1482_v36  ;;  %v5015_v50 = vld [vmem:[#allocation55_spill] sm:$0xff]  ;;  %v5016_v42 = vld [vmem:[#allocation36_spill] sm:$0xff] }
 0x25e   : > { %v1212_v49 = vsel %vm935_vm1, %v5000_v55, %v4998_v23  ;;  %v1586_v1 = vmul.f32 %v4365_v3, %v1030_v57  ;;  %v1726_v37 = vmax.f32 %v1694_v29, 0.0  ;;  %v1550_v24 = vadd.f32 %v1519_v34, %v1483_v39  ;;  %v5018_v39 = vld [vmem:[#allocation20_spill] sm:$0xff] }
 0x25f   : > { %v1386_v56 = vmul.f32 %v3119_v43, %v1212_v49  ;;  %v1348_v18 = vadd.f32 %v5003_v26, %v1280_v11  ;;  %v1349_v13 = vadd.f32 %v5004_v5, %v1281_v45  ;;  %v1617_v33 = vadd.f32 %v1585_v52, %v1549_v20 }
 0x260   : > { %v1453_v61 = vmul.f32 %v3124_v47, %v5005_v28  ;;  %v1587_v2 = vmul.f32 %v4365_v3, %v1212_v49  ;;  %v1282_v17 = vadd.f32 %v5006_v54, %v1200_v7  ;;  %v1745_v62 = vpack.c.bf16 %v1726_v37, %v1725_v31  ;;  %v5011_v7 = vld [vmem:[#allocation17_spill] sm:$0xff]  ;;  %v4460_v54 = vld [vmem:[%s4658_s8] ss:$0 sm:$0xff] }
 0x261   : > { %v1618_v8 = vadd.f32 %v1586_v1, %v1550_v24  ;;  %v1416_v10 = vadd.f32 %v1384_v59, %v1348_v18  ;;  %v1417_v57 = vadd.f32 %v1385_v35, %v1349_v13  ;;  %v1656_v43 = vmul.f32 %v4392_v4, %v1617_v33  ;;  %v5012_v35 = vld [vmem:[#allocation31_spill] sm:$0xff] }
 0x262   : > { %v1283_v6 = vadd.f32 %v5007_v0, %v1201_v21  ;;  %v1350_v32 = vadd.f32 %v5008_v9, %v1282_v17  ;;  %v1454_v63 = vmul.f32 %v3124_v47, %v5009_v46  ;;  %2413 = vmatprep.mubr.bf16.mxu1 %v1745_v62  ;;  %v1455_v60 = vmul.f32 %v3124_v47, %v5011_v7  ;;  %v5017_v47 = vld [vmem:[#allocation19_spill] sm:$0xff] }
 0x263   : > { %v1657_v41 = vmul.f32 %v4392_v4, %v1618_v8  ;;  %v1484_v53 = vadd.f32 %v5010_v19, %v1416_v10  ;;  %v1485_v14 = vadd.f32 %v1453_v61, %v1417_v57  ;;  %v1695_v59 = vadd.f32 %v4407_v44, %v1656_v43 }
 0x264   : > { %v1351_v12 = vadd.f32 %v5012_v35, %v1283_v6  ;;  %v1418_v27 = vadd.f32 %v1386_v56, %v1350_v32  ;;  %v1522_v21 = vmul.f32 0.0, %v3133_v51  ;;  %v1588_v34 = vmul.f32 %v4365_v3, %v5015_v50  ;;  %v2526_v32 = vld [vmem:[%s3023_s1 + $0x10] sm:$0xff] }
 0x265   : > { %v1696_v22 = vadd.f32 %v4407_v44, %v1657_v41  ;;  %v1551_v48 = vadd.f32 %v5013_v15, %v1484_v53  ;;  %v1552_v25 = vadd.f32 %v5014_v58, %v1485_v14  ;;  %v1589_v38 = vmul.f32 %v4365_v3, %v5017_v47  ;;  %v2527_v41 = vld [vmem:[%s3023_s1] sm:$0xff]  ;;  %v2528_v14 = vld [vmem:[%s3023_s1 + $0x18] sm:$0xff] }
 0x266   : > { %v1419_v36 = vadd.f32 %v5016_v42, %v1351_v12  ;;  %v1486_v52 = vadd.f32 %v1454_v63, %v1418_v27  ;;  %v1727_v23 = vmax.f32 %v1695_v59, 0.0  ;;  %v1590_v30 = vmul.f32 %v4365_v3, %v5018_v39 }
 0x267   : > { %v1728_v16 = vmax.f32 %v1696_v22, 0.0  ;;  %v1619_v55 = vadd.f32 %v1587_v2, %v1551_v48  ;;  %v1620_v49 = vadd.f32 %v1588_v34, %v1552_v25  ;;  %v2530_v34 = vld [vmem:[%s3023_s1 + $0x30] sm:$0xff] }
 0x268   : > { %v1487_v51 = vadd.f32 %v1455_v60, %v1419_v36  ;;  %v1553_v29 = vadd.f32 %v1522_v21, %v1486_v52  ;;  %v2529_v60 = vld [vmem:[%s3023_s1 + $0x8] sm:$0xff]  ;;  %v2531_v52 = vld [vmem:[%s3023_s1 + $0x20] sm:$0xff] }
 0x269   : > { %v1746_v11 = vpack.c.bf16 %v1728_v16, %v1727_v23  ;;  %v1658_v40 = vmul.f32 %v4392_v4, %v1619_v55  ;;  %v1659_v45 = vmul.f32 %v4392_v4, %v1620_v49  ;;  %v2532_v23 = vld [vmem:[%s3023_s1 + $0x38] sm:$0xff]  ;;  %v2533_v55 = vld [vmem:[%s3023_s1 + $0x28] sm:$0xff] }
 0x26a   : > { %v1554_v31 = vadd.f32 %v1522_v21, %v1487_v51  ;;  %v1621_v20 = vadd.f32 %v1589_v38, %v1553_v29 }
 0x26b   : > { %2414 = vmatmul.mubr.bf16.gmra.mrb[24].mxu1 %v1746_v11  ;;  %v1697_v1 = vadd.f32 %v4407_v44, %v1658_v40  ;;  %v1698_v56 = vadd.f32 %v4407_v44, %v1659_v45 }
 0x26c   : > { %v1622_v37 = vadd.f32 %v1590_v30, %v1554_v31  ;;  %v1660_v24 = vmul.f32 %v4392_v4, %v1621_v20 }
 0x26d   : > { %v1729_v26 = vmax.f32 %v1697_v1, 0.0  ;;  %v1730_v18 = vmax.f32 %v1698_v56, 0.0  ;;  %v2534_v56 = vld [vmem:[%s3023_s1 + $0x50] sm:$0xff] }
 0x26e   : > { %v1661_v5 = vmul.f32 %v4392_v4, %v1622_v37  ;;  %v1699_v3 = vadd.f32 %v4407_v44, %v1660_v24  ;;  %v4465_v4 = vld [vmem:[%s5019_s26] ss:$0 sm:$0xff] }
 0x26f   : > { %v1747_v13 = vpack.c.bf16 %v1730_v18, %v1729_v26  ;;  %v2535_v26 = vld [vmem:[%s3023_s1 + $0x40] sm:$0xff] }
 0x270   : > { %v1700_v33 = vadd.f32 %v4407_v44, %v1661_v5  ;;  %v1731_v28 = vmax.f32 %v1699_v3, 0.0  ;;  %v2536_v3 = vld [vmem:[%s3023_s1 + $0x58] sm:$0xff] }
 0x271   : > { %2417 = vmatprep.mubr.bf16.mxu1 %v1747_v13 }
 0x272   : > { %v1732_v61 = vmax.f32 %v1700_v33, 0.0  ;;  %v2537_v33 = vld [vmem:[%s3023_s1 + $0x48] sm:$0xff] }
 0x274   : > { %v1748_v2 = vpack.c.bf16 %v1732_v61, %v1731_v28 }
 0x276   : > { %2418 = vmatmul.mubr.bf16.gmra.mrb[28].mxu1 %v1748_v2 }
 0x2b1   : > { %v2391_v17 = vpop.f32.mrb[0].mxu1 }
 0x2b2   : > { %v1983_v44 = vmul.f32 %v2391_v17, %v4460_v54  ;;  %v1847_v62 = vpop.f32.mrb[1].mxu1 }
 0x2b3   : > { %v1981_v8 = vmul.f32 %v4460_v54, %v1847_v62  ;;  %v2392_v10 = vpop.f32.mrb[2].mxu1 }
 0x2b4   : > { %v2022_v57 = vadd.f32 %v4465_v4, %v1983_v44  ;;  %v1984_v43 = vmul.f32 %v2392_v10, %v4460_v54  ;;  %v1850_v0 = vpop.f32.mrb[3].mxu1 }
 0x2b5   : > { %v2020_v6 = vadd.f32 %v4465_v4, %v1981_v8  ;;  %v1982_v9 = vmul.f32 %v4460_v54, %v1850_v0 }
 0x2b6   : > { %v2054_v46 = vadd.f32 %v2526_v32, %v2022_v57  ;;  %v2023_v63 = vadd.f32 %v4465_v4, %v1984_v43 }
 0x2b7   : > { %v2052_v19 = vadd.f32 %v2527_v41, %v2020_v6  ;;  %v2021_v53 = vadd.f32 %v4465_v4, %v1982_v9  ;;  %v2538_v6 = vld [vmem:[%s3023_s1 + $0x70] sm:$0xff] }
 0x2b8   : > { %2086 = vst [vmem:[%s4479_s30 + $0x10] sm:$0xff] %v2054_v46  ;;  %v2055_v7 = vadd.f32 %v2528_v14, %v2023_v63  ;;  %v2539_v46 = vld [vmem:[%s3023_s1 + $0x60] sm:$0xff]  ;;  %v2541_v14 = vld [vmem:[%s3023_s1 + $0x68] sm:$0xff] }
 0x2b9   : > { %2084 = vst [vmem:[%s4479_s30] sm:$0xff] %v2052_v19  ;;  %v2053_v59 = vadd.f32 %v2529_v60, %v2021_v53  ;;  %v2540_v19 = vld [vmem:[%s3023_s1 + $0x78] sm:$0xff] }
 0x2ba   : > { %2087 = vst [vmem:[%s4479_s30 + $0x18] sm:$0xff] %v2055_v7 }
 0x2bb   : > { %2085 = vst [vmem:[%s4479_s30 + $0x8] sm:$0xff] %v2053_v59 }
 0x2ce   : > { %v2395_v35 = vpop.f32.mrb[4].mxu1 }
 0x2cf   : > { %v1987_v12 = vmul.f32 %v2395_v35, %v4460_v54  ;;  %v1863_v27 = vpop.f32.mrb[5].mxu1 }
 0x2d0   : > { %v1985_v21 = vmul.f32 %v4460_v54, %v1863_v27  ;;  %v2396_v22 = vpop.f32.mrb[6].mxu1 }
 0x2d1   : > { %v2026_v15 = vadd.f32 %v4465_v4, %v1987_v12  ;;  %v1988_v48 = vmul.f32 %v2396_v22, %v4460_v54  ;;  %v1866_v58 = vpop.f32.mrb[7].mxu1 }
 0x2d2   : > { %v2024_v25 = vadd.f32 %v4465_v4, %v1985_v21  ;;  %v1986_v50 = vmul.f32 %v4460_v54, %v1866_v58 }
 0x2d3   : > { %v2058_v42 = vadd.f32 %v2530_v34, %v2026_v15  ;;  %v2027_v36 = vadd.f32 %v4465_v4, %v1988_v48 }
 0x2d4   : > { %v2056_v47 = vadd.f32 %v2531_v52, %v2024_v25  ;;  %v2025_v38 = vadd.f32 %v4465_v4, %v1986_v50  ;;  %v2542_v25 = vld [vmem:[%s3023_s1 + $0x90] sm:$0xff] }
 0x2d5   : > { %2090 = vst [vmem:[%s4479_s30 + $0x30] sm:$0xff] %v2058_v42  ;;  %v2059_v16 = vadd.f32 %v2532_v23, %v2027_v36  ;;  %v2543_v42 = vld [vmem:[%s3023_s1 + $0x80] sm:$0xff]  ;;  %v2545_v23 = vld [vmem:[%s3023_s1 + $0x88] sm:$0xff] }
 0x2d6   : > { %2088 = vst [vmem:[%s4479_s30 + $0x20] sm:$0xff] %v2056_v47  ;;  %v2057_v49 = vadd.f32 %v2533_v55, %v2025_v38  ;;  %v2544_v47 = vld [vmem:[%s3023_s1 + $0x98] sm:$0xff] }
 0x2d7   : > { %2091 = vst [vmem:[%s4479_s30 + $0x38] sm:$0xff] %v2059_v16 }
 0x2d8   : > { %2089 = vst [vmem:[%s4479_s30 + $0x28] sm:$0xff] %v2057_v49 }
 0x2ea   : > { %v2399_v51 = vpop.f32.mrb[8].mxu1 }
 0x2eb   : > { %v1991_v29 = vmul.f32 %v2399_v51, %v4460_v54  ;;  %v1879_v39 = vpop.f32.mrb[9].mxu1 }
 0x2ec   : > { %v1989_v30 = vmul.f32 %v4460_v54, %v1879_v39  ;;  %v2400_v11 = vpop.f32.mrb[10].mxu1 }
 0x2ed   : > { %v2030_v40 = vadd.f32 %v4465_v4, %v1991_v29  ;;  %v1992_v45 = vmul.f32 %v2400_v11, %v4460_v54  ;;  %v1882_v31 = vpop.f32.mrb[11].mxu1 }
 0x2ee   : > { %v2028_v20 = vadd.f32 %v4465_v4, %v1989_v30  ;;  %v1990_v1 = vmul.f32 %v4460_v54, %v1882_v31 }
 0x2ef   : > { %v2062_v37 = vadd.f32 %v2534_v56, %v2030_v40  ;;  %v2031_v24 = vadd.f32 %v4465_v4, %v1992_v45 }
 0x2f0   : > { %v2060_v18 = vadd.f32 %v2535_v26, %v2028_v20  ;;  %v2029_v5 = vadd.f32 %v4465_v4, %v1990_v1  ;;  %v2546_v20 = vld [vmem:[%s3023_s1 + $0xb0] sm:$0xff] }
 0x2f1   : > { %2094 = vst [vmem:[%s4479_s30 + $0x50] sm:$0xff] %v2062_v37  ;;  %v2063_v13 = vadd.f32 %v2536_v3, %v2031_v24  ;;  %v2547_v37 = vld [vmem:[%s3023_s1 + $0xa0] sm:$0xff]  ;;  %v2549_v3 = vld [vmem:[%s3023_s1 + $0xa8] sm:$0xff] }
 0x2f2   : > { %2092 = vst [vmem:[%s4479_s30 + $0x40] sm:$0xff] %v2060_v18  ;;  %v2061_v28 = vadd.f32 %v2537_v33, %v2029_v5  ;;  %v2548_v18 = vld [vmem:[%s3023_s1 + $0xb8] sm:$0xff] }
 0x2f3   : > { %2095 = vst [vmem:[%s4479_s30 + $0x58] sm:$0xff] %v2063_v13 }
 0x2f4   : > { %2093 = vst [vmem:[%s4479_s30 + $0x48] sm:$0xff] %v2061_v28 }
 0x306   : > { %v2403_v61 = vpop.f32.mrb[12].mxu1 }
 0x307   : > { %v1995_v2 = vmul.f32 %v2403_v61, %v4460_v54  ;;  %v1895_v17 = vpop.f32.mrb[13].mxu1 }
 0x308   : > { %v1993_v44 = vmul.f32 %v4460_v54, %v1895_v17  ;;  %v2404_v62 = vpop.f32.mrb[14].mxu1 }
 0x309   : > { %v2034_v8 = vadd.f32 %v4465_v4, %v1995_v2  ;;  %v1996_v10 = vmul.f32 %v2404_v62, %v4460_v54  ;;  %v1898_v57 = vpop.f32.mrb[15].mxu1 }
 0x30a   : > { %v2032_v43 = vadd.f32 %v4465_v4, %v1993_v44  ;;  %v1994_v0 = vmul.f32 %v4460_v54, %v1898_v57 }
 0x30b   : > { %v2066_v9 = vadd.f32 %v2538_v6, %v2034_v8  ;;  %v2035_v32 = vadd.f32 %v4465_v4, %v1996_v10 }
 0x30c   : > { %v2064_v63 = vadd.f32 %v2539_v46, %v2032_v43  ;;  %v2033_v41 = vadd.f32 %v4465_v4, %v1994_v0  ;;  %v2550_v43 = vld [vmem:[%s3023_s1 + $0xd0] sm:$0xff] }
 0x30d   : > { %2098 = vst [vmem:[%s4479_s30 + $0x70] sm:$0xff] %v2066_v9  ;;  %v2067_v53 = vadd.f32 %v2540_v19, %v2035_v32  ;;  %v2551_v9 = vld [vmem:[%s3023_s1 + $0xc0] sm:$0xff]  ;;  %v2553_v19 = vld [vmem:[%s3023_s1 + $0xc8] sm:$0xff] }
 0x30e   : > { %2096 = vst [vmem:[%s4479_s30 + $0x60] sm:$0xff] %v2064_v63  ;;  %v2065_v7 = vadd.f32 %v2541_v14, %v2033_v41  ;;  %v2552_v63 = vld [vmem:[%s3023_s1 + $0xd8] sm:$0xff] }
 0x30f   : > { %2099 = vst [vmem:[%s4479_s30 + $0x78] sm:$0xff] %v2067_v53 }
 0x310   : > { %2097 = vst [vmem:[%s4479_s30 + $0x68] sm:$0xff] %v2065_v7 }
 0x31a   : > { %v2407_v60 = vpop.f32.mrb[16].mxu1 }
 0x31b   : > { %v1999_v59 = vmul.f32 %v2407_v60, %v4460_v54  ;;  %v1911_v35 = vpop.f32.mrb[17].mxu1 }
 0x31c   : > { %v1997_v12 = vmul.f32 %v4460_v54, %v1911_v35  ;;  %v2408_v27 = vpop.f32.mrb[18].mxu1 }
 0x31d   : > { %v2038_v21 = vadd.f32 %v4465_v4, %v1999_v59  ;;  %v2000_v22 = vmul.f32 %v2408_v27, %v4460_v54  ;;  %v1914_v15 = vpop.f32.mrb[19].mxu1 }
 0x31e   : > { %v2036_v48 = vadd.f32 %v4465_v4, %v1997_v12  ;;  %v1998_v58 = vmul.f32 %v4460_v54, %v1914_v15 }
 0x31f   : > { %v2070_v50 = vadd.f32 %v2542_v25, %v2038_v21  ;;  %v2039_v34 = vadd.f32 %v4465_v4, %v2000_v22 }
 0x320   : > { %v2068_v36 = vadd.f32 %v2543_v42, %v2036_v48  ;;  %v2037_v52 = vadd.f32 %v4465_v4, %v1998_v58  ;;  %v2554_v48 = vld [vmem:[%s3023_s1 + $0xf0] sm:$0xff] }
 0x321   : > { %2102 = vst [vmem:[%s4479_s30 + $0x90] sm:$0xff] %v2070_v50  ;;  %v2071_v38 = vadd.f32 %v2544_v47, %v2039_v34  ;;  %v2555_v50 = vld [vmem:[%s3023_s1 + $0xe0] sm:$0xff] }
 0x322   : > { %2100 = vst [vmem:[%s4479_s30 + $0x80] sm:$0xff] %v2068_v36  ;;  %v2069_v16 = vadd.f32 %v2545_v23, %v2037_v52  ;;  %v2556_v36 = vld [vmem:[%s3023_s1 + $0xf8] sm:$0xff] }
 0x323   : > { %2103 = vst [vmem:[%s4479_s30 + $0x98] sm:$0xff] %v2071_v38 }
 0x324   : > { %2101 = vst [vmem:[%s4479_s30 + $0x88] sm:$0xff] %v2069_v16 }
 0x32b   : > { %v2411_v55 = vpop.f32.mrb[20].mxu1 }
 0x32c   : > { %v2003_v49 = vmul.f32 %v2411_v55, %v4460_v54  ;;  %v1927_v51 = vpop.f32.mrb[21].mxu1 }
 0x32d   : > { %v2001_v29 = vmul.f32 %v4460_v54, %v1927_v51  ;;  %v2412_v39 = vpop.f32.mrb[22].mxu1 }
 0x32e   : > { %v2042_v30 = vadd.f32 %v4465_v4, %v2003_v49  ;;  %v2004_v11 = vmul.f32 %v2412_v39, %v4460_v54  ;;  %v1930_v40 = vpop.f32.mrb[23].mxu1 }
 0x32f   : > { %v2040_v45 = vadd.f32 %v4465_v4, %v2001_v29  ;;  %v2002_v31 = vmul.f32 %v4460_v54, %v1930_v40 }
 0x330   : > { %v2074_v1 = vadd.f32 %v2546_v20, %v2042_v30  ;;  %v2043_v56 = vadd.f32 %v4465_v4, %v2004_v11 }
 0x331   : > { %v2072_v24 = vadd.f32 %v2547_v37, %v2040_v45  ;;  %v2041_v26 = vadd.f32 %v4465_v4, %v2002_v31 }
 0x332   : > { %2106 = vst [vmem:[%s4479_s30 + $0xb0] sm:$0xff] %v2074_v1  ;;  %v2075_v5 = vadd.f32 %v2548_v18, %v2043_v56 }
 0x333   : > { %2104 = vst [vmem:[%s4479_s30 + $0xa0] sm:$0xff] %v2072_v24  ;;  %v2073_v13 = vadd.f32 %v2549_v3, %v2041_v26 }
 0x334   : > { %2107 = vst [vmem:[%s4479_s30 + $0xb8] sm:$0xff] %v2075_v5 }
 0x335   : > { %2105 = vst [vmem:[%s4479_s30 + $0xa8] sm:$0xff] %v2073_v13 }
 0x33e   : > { %v2415_v33 = vpop.f32.mrb[24].mxu1 }
 0x33f   : > { %v2007_v28 = vmul.f32 %v2415_v33, %v4460_v54  ;;  %v1943_v61 = vpop.f32.mrb[25].mxu1 }
 0x340   : > { %v2005_v2 = vmul.f32 %v4460_v54, %v1943_v61  ;;  %v2416_v17 = vpop.f32.mrb[26].mxu1 }
 0x341   : > { %v2046_v44 = vadd.f32 %v4465_v4, %v2007_v28  ;;  %v2008_v62 = vmul.f32 %v2416_v17, %v4460_v54  ;;  %v1946_v8 = vpop.f32.mrb[27].mxu1 }
 0x342   : > { %v2044_v10 = vadd.f32 %v4465_v4, %v2005_v2  ;;  %v2006_v57 = vmul.f32 %v4460_v54, %v1946_v8 }
 0x343   : > { %v2078_v0 = vadd.f32 %v2550_v43, %v2046_v44  ;;  %v2047_v6 = vadd.f32 %v4465_v4, %v2008_v62 }
 0x344   : > { %v2076_v32 = vadd.f32 %v2551_v9, %v2044_v10  ;;  %v2045_v46 = vadd.f32 %v4465_v4, %v2006_v57 }
 0x345   : > { %2110 = vst [vmem:[%s4479_s30 + $0xd0] sm:$0xff] %v2078_v0  ;;  %v2079_v41 = vadd.f32 %v2552_v63, %v2047_v6 }
 0x346   : > { %2108 = vst [vmem:[%s4479_s30 + $0xc0] sm:$0xff] %v2076_v32  ;;  %v2077_v53 = vadd.f32 %v2553_v19, %v2045_v46 }
 0x347   : > { %2111 = vst [vmem:[%s4479_s30 + $0xd8] sm:$0xff] %v2079_v41 }
 0x348   : > { %2109 = vst [vmem:[%s4479_s30 + $0xc8] sm:$0xff] %v2077_v53 }
 0x349   : > { %v2419_v14 = vpop.f32.mrb[28].mxu1 }
 0x34a   : > { %v2011_v7 = vmul.f32 %v2419_v14, %v4460_v54  ;;  %v1959_v60 = vpop.f32.mrb[29].mxu1 }
 0x34b   : > { %v2009_v59 = vmul.f32 %v4460_v54, %v1959_v60  ;;  %v2420_v35 = vpop.f32.mrb[30].mxu1 }
 0x34c   : > { %v2050_v12 = vadd.f32 %v4465_v4, %v2011_v7  ;;  %v2012_v27 = vmul.f32 %v2420_v35, %v4460_v54  ;;  %v1962_v21 = vpop.f32.mrb[31].mxu1 }
 0x34d   : > { %v2048_v22 = vadd.f32 %v4465_v4, %v2009_v59  ;;  %v2010_v15 = vmul.f32 %v4460_v54, %v1962_v21  ;;  %v2557_v54 = vld [vmem:[%s3023_s1 + $0xe8] sm:$0xff] }
 0x34e   : > { %v2082_v58 = vadd.f32 %v2554_v48, %v2050_v12  ;;  %v2051_v25 = vadd.f32 %v4465_v4, %v2012_v27 }
 0x34f   : > { %v2080_v34 = vadd.f32 %v2555_v50, %v2048_v22  ;;  %v2049_v42 = vadd.f32 %v4465_v4, %v2010_v15 }
 0x350   : > { %2114 = vst [vmem:[%s4479_s30 + $0xf0] sm:$0xff] %v2082_v58  ;;  %v2083_v52 = vadd.f32 %v2556_v36, %v2051_v25 }
 0x351   : > { %2112 = vst [vmem:[%s4479_s30 + $0xe0] sm:$0xff] %v2080_v34  ;;  %v2081_v47 = vadd.f32 %v2557_v54, %v2049_v42 }
 0x352   : > { %2115 = vst [vmem:[%s4479_s30 + $0xf8] sm:$0xff] %v2083_v52 }
 0x353   : > { %2113 = vst [vmem:[%s4479_s30 + $0xe8] sm:$0xff] %v2081_v47 }
 0x354   : > { %2685 = shalt.err (!%p2682_p4)
}
 0x355   : > { %s2686_s1 = scalar_lea.hbm %s4600_s17, 4096  ;;  %s2690_s26 = scalar_lea.hbm %s5020_s23, 8192 }
 0x356   : > { %p2687_p9 = scmp.ne.s32.totalorder %s4600_s17, %s2686_s1  ;;  %p2691_p8 = scmp.lt.u32.totalorder %s4600_s17, %s5020_s23 }
 0x357   : > { %p2692_p13 = scmp.lt.u32.totalorder %s2690_s26, %s2686_s1  ;;  %p2694_p10 = scmp.lt.u32.totalorder %s2686_s1, %s4600_s17 }
 0x358   : > { %p2688_p0 = pnand %p2687_p9, %p2966_p5 }
 0x359   : > { %p2693_p6 = por %p2692_p13, %p2691_p8 }
 0x35a   : > { %p2689_p11 = pneg %p2688_p0 }
 0x35b   : > { %p2695_p3 = por %p2694_p10, %p2693_p6 }
 0x35d   : > { %p2696_p7 = pnand %p2695_p3, %p2689_p11 }
 0x35f   : > { %2699 = shalt.err (!%p2696_p7)
}
 0x360   : > { %s2758_s24 = smov 128   ;;  %s2759_s22 = smov 8  }
 0x361   : > { %2435 = dma.vmem_to_hbm [thread:$0]  (%p2966_p5), %s4602_s27, 4096, %s4600_s17, %s2117_s19, %s2758_s24, %s2758_s24, %s2759_s22  }
 0x362 PF: > { %s5021_s21 = sld [smem:[#allocation15_spill]]  ;;  %s5022_s20 = sld [smem:[#allocation16_spill]] }
 0x363   : > { %p5024_p1 = scmp.ge.s32.totalorder %s2746_s16, 2 }
 0x368   : > { %s2145_s10 = sand.u32 1, %s5021_s21   ;;  %p5023_p12 = scmp.ne.s32.totalorder %s5022_s20, 0 }
 0x369   : > { %s2146_s11 = scalar_lea.sflag [#allocation4], %s2145_s10 }
 0x36a   : > { %p2452_p2 = pnand %p5024_p1, %p5023_p12 }
 0x36c   : > { %2729 = dma.done.wait (!%p2452_p2), %s2146_s11, 4096  }
 0x36d   : > { %2731 = vsyncadd (!%p2452_p2), %s2146_s11, 4294963200  ;;  %s5025_s1 = smov %s2962_s13  ;;  %p25_p4 = scmp.ge.s32.totalorder %s2931_s18, 4  }
 0x36e   : > { %s5026_s13 = smov %s2738_s14  ;;  %s5027_s14 = smov %s2742_s15 }
 0x36f   : > { %s5028_s15 = smov %s5025_s1  ;;  %s5029_s16 = smov %s2931_s18 }
 0x370   :  { %27 = sbr.rel (!%p25_p4) target bundleno = 11 (0xb), region = 117 }
 0x377   :  { %2151 = vsyncpa [#allocation3], 1 }
 0x378   :  { %2153 = vsyncpa [#allocation3 + $0x1], 1 }
 0x379   :  { %2154 = vsyncpa [#allocation6], 1 }
 0x37a   :  { %2155 = vsyncpa [#allocation9], 1 }
 0x37b   :  { %2156 = vsyncpa [#allocation4], 1 }
 0x37c   :  { %2158 = vsyncpa [#allocation4 + $0x1], 1 }

</bundles_post_ra>
